<compile_context>
chip_gen: v7x
topology: tpu7x:2x2x1
jax: 0.10.0
libtpu: 0.0.40
codegen_flags: <defaults>
</compile_context>

<pallas_src>
import functools

import jax
import jax.numpy as jnp
from jax.experimental import pallas as pl
from jax.experimental.pallas import tpu as pltpu

LANE = 128
TILE = 256                       # TM = TK; 256-deep contractions fill v6e/v7x MXU
BN_EPS = 1e-5
VMEM_LIMIT = 48 * 1024 * 1024    # > 16/32 MiB scoped defaults, < 64 MiB v7x physical


def _round_up(n, m):
    return ((n + m - 1) // m) * m


def _pad_to(a, shape):
    return jnp.pad(a, [(0, s - d) for d, s in zip(a.shape, shape)])


# ----------------------------- Pallas kernels ------------------------------- #

def _gcn_layer_kernel(n_true, tm, first_layer,
                      a_ref, h_ref, s_ref, t_ref, w_ref, b_ref,
                      z_ref, sum_ref, sq_ref):
    """One GCN layer, tiled: z[i] = sum_k A[i,k] @ (act(h[k]) @ W) + b.

    act() is the PREVIOUS layer's BatchNorm-apply + ReLU (fused here so raw z
    is the only activation that round-trips HBM).  Emits per-row-tile column
    sum / sum-of-squares for single-pass BN statistics of THIS layer.
    """
    i = pl.program_id(0)
    k = pl.program_id(1)
    nk = pl.num_programs(1)

    if first_layer:
        h = h_ref[...].astype(jnp.bfloat16)
    else:
        # previous layer's folded BN (scale/shift) + ReLU, f32 epilogue
        h = jnp.maximum(h_ref[...] * s_ref[...] + t_ref[...], 0.0).astype(jnp.bfloat16)

    # transform on the MXU: (TK, Cin) @ (Cin, Cout), f32 accumulation
    xw = jnp.dot(h, w_ref[...], preferred_element_type=jnp.float32)

    @pl.when(k == 0)
    def _():
        z_ref[...] = jnp.zeros_like(z_ref)

    # propagate: accumulate A_tile @ XW_tile into the row-resident output
    z_ref[...] += jnp.dot(a_ref[...], xw.astype(jnp.bfloat16),
                          preferred_element_type=jnp.float32)

    @pl.when(k == nk - 1)
    def _():
        # add bias, zero padded rows, single-pass BN stats (sum, sumsq) in f32
        rows = i * tm + jax.lax.broadcasted_iota(jnp.int32, (tm, 1), 0)
        z = jnp.where(rows < n_true, z_ref[...] + b_ref[...], 0.0)
        z_ref[...] = z
        sum_ref[...] = jnp.sum(z, axis=0, keepdims=True).reshape(1, 1, z.shape[1])
        sq_ref[...] = jnp.sum(z * z, axis=0, keepdims=True).reshape(1, 1, z.shape[1])


def _gcn_head_kernel(z_ref, s_ref, t_ref, w1_ref, b1_ref, w2_ref, b2_ref, o_ref):
    """Last layer's BN+ReLU fused with fc1 -> ReLU -> fc2 -> sigmoid, per row tile."""
    h = jnp.maximum(z_ref[...] * s_ref[...] + t_ref[...], 0.0).astype(jnp.bfloat16)
    h1 = jnp.maximum(
        jnp.dot(h, w1_ref[...], preferred_element_type=jnp.float32) + b1_ref[...], 0.0)
    z2 = jnp.dot(h1.astype(jnp.bfloat16), w2_ref[...],
                 preferred_element_type=jnp.float32) + b2_ref[...]
    o_ref[...] = jax.nn.sigmoid(z2)      # EUP; padded cols/rows sliced in wrapper


# ----------------------------- pallas_call glue ------------------------------ #

def _gcn_layer(a_pad, h_prev, s_prev, t_prev, w, b, *, n_true, first_layer, tm, tk):
    n_pad = a_pad.shape[0]
    cin_p = h_prev.shape[1]
    cout_p = w.shape[1]
    n_i = n_pad // tm
    n_k = n_pad // tk

    kernel = functools.partial(_gcn_layer_kernel, n_true, tm, first_layer)

    return pl.pallas_call(
        kernel,
        grid=(n_i, n_k),
        in_specs=[
            pl.BlockSpec((tm, tk), lambda i, k: (i, k)),           # A_hat tile (bf16)
            pl.BlockSpec((tk, cin_p), lambda i, k: (k, 0)),        # prev activation rows
            pl.BlockSpec((1, cin_p), lambda i, k: (0, 0)),         # prev-layer BN scale
            pl.BlockSpec((1, cin_p), lambda i, k: (0, 0)),         # prev-layer BN shift
            pl.BlockSpec((cin_p, cout_p), lambda i, k: (0, 0)),    # weight (grid-invariant)
            pl.BlockSpec((1, cout_p), lambda i, k: (0, 0)),        # bias
        ],
        out_specs=[
            pl.BlockSpec((tm, cout_p), lambda i, k: (i, 0)),       # z (accumulated over k)
            pl.BlockSpec((1, 1, cout_p), lambda i, k: (i, 0, 0)),  # per-tile col sum
            pl.BlockSpec((1, 1, cout_p), lambda i, k: (i, 0, 0)),  # per-tile col sumsq
        ],
        out_shape=[
            jax.ShapeDtypeStruct((n_pad, cout_p), jnp.float32),
            jax.ShapeDtypeStruct((n_i, 1, cout_p), jnp.float32),
            jax.ShapeDtypeStruct((n_i, 1, cout_p), jnp.float32),
        ],
        compiler_params=pltpu.CompilerParams(
            dimension_semantics=("parallel", "arbitrary"),
            vmem_limit_bytes=VMEM_LIMIT),
        cost_estimate=pl.CostEstimate(
            flops=2 * n_pad * n_pad * cout_p + 2 * n_pad * cin_p * cout_p * n_i,
            transcendentals=0,
            bytes_accessed=(2 * n_pad * n_pad + 4 * n_pad * cin_p * n_i
                            + 2 * cin_p * cout_p + 4 * n_pad * cout_p)),
    )(a_pad, h_prev, s_prev, t_prev, w, b)


def _gcn_head(z, s, t, w1, b1, w2, b2, *, tm):
    n_pad, c_p = z.shape
    c2_p = w1.shape[1]
    o_p = w2.shape[1]
    n_i = n_pad // tm
    return pl.pallas_call(
        _gcn_head_kernel,
        grid=(n_i,),
        in_specs=[
            pl.BlockSpec((tm, c_p), lambda i: (i, 0)),
            pl.BlockSpec((1, c_p), lambda i: (0, 0)),
            pl.BlockSpec((1, c_p), lambda i: (0, 0)),
            pl.BlockSpec((c_p, c2_p), lambda i: (0, 0)),
            pl.BlockSpec((1, c2_p), lambda i: (0, 0)),
            pl.BlockSpec((c2_p, o_p), lambda i: (0, 0)),
            pl.BlockSpec((1, o_p), lambda i: (0, 0)),
        ],
        out_specs=pl.BlockSpec((tm, o_p), lambda i: (i, 0)),
        out_shape=jax.ShapeDtypeStruct((n_pad, o_p), jnp.float32),
        compiler_params=pltpu.CompilerParams(
            dimension_semantics=("parallel",),
            vmem_limit_bytes=VMEM_LIMIT),
        cost_estimate=pl.CostEstimate(
            flops=2 * n_pad * (c_p * c2_p + c2_p * o_p),
            transcendentals=n_pad * o_p,
            bytes_accessed=(4 * n_pad * (c_p + o_p)
                            + 2 * (c_p * c2_p + c2_p * o_p))),
    )(z, s, t, w1, b1, w2, b2)


# ------------------------------ plain-JAX glue ------------------------------- #

def build_normalized_adjacency(edge_index, num_nodes):
    """Dense A_hat = D^-1/2 (A + I) D^-1/2 from a (2, E) edge_index."""
    src, dst = edge_index[0], edge_index[1]
    a = jnp.zeros((num_nodes, num_nodes), jnp.float32)
    a = a.at[dst, src].add(1.0)                       # duplicate edges summed (PyG parity)
    a = a + jnp.eye(num_nodes, dtype=jnp.float32)     # self loops
    deg = jnp.sum(a, axis=1)
    d = jnp.where(deg > 0, jax.lax.rsqrt(deg), 0.0)
    return d[:, None] * a * d[None, :]


def prepare_adjacency(a_hat, tile=TILE, dtype=jnp.bfloat16):
    """One-time: pad node dim to a tile multiple and cast for the MXU.

    Padded rows/cols are zero, so padded nodes never contribute to propagation.
    """
    # TODO(synk): on v7x use jnp.float8_e4m3fn here (MXU supports bf16+fp8) to
    # halve the dominant N^2 VMEM/HBM term; keep bf16 default for v5e/v6e.
    n = a_hat.shape[0]
    n_pad = _round_up(n, tile)
    return _pad_to(a_hat, (n_pad, n_pad)).astype(dtype)


def init_params(key, input_dim, hidden_dims, output_dim):
    """Deterministic parameter init matching the module's __init__ shapes."""
    dims = [input_dim] + list(hidden_dims) + [hidden_dims[-1]]   # convs[:-1] applied
    params = {"convs": [], "bns": []}
    for cin, cout in zip(dims[:-1], dims[1:]):
        key, k = jax.random.split(key)
        w = jax.random.normal(k, (cin, cout), jnp.float32) * 0.1
        params["convs"].append((w, jnp.zeros((1, cout), jnp.float32)))
        params["bns"].append((jnp.ones((1, cout), jnp.float32),
                              jnp.zeros((1, cout), jnp.float32)))
    h = hidden_dims[-1]
    key, k1, k2 = jax.random.split(key, 3)
    params["fc1"] = (jax.random.normal(k1, (h, h // 2), jnp.float32) * 0.1,
                     jnp.zeros((1, h // 2), jnp.float32))
    params["fc2"] = (jax.random.normal(k2, (h // 2, output_dim), jnp.float32) * 0.1,
                     jnp.zeros((1, output_dim), jnp.float32))
    return params


def prepare_params(params):
    """One-time: pad channel dims to 128 lanes, cast matmul weights to bf16."""
    prep = {"layers": []}
    for (w, b), (g, be) in zip(params["convs"], params["bns"]):
        cin_p, cout_p = _round_up(w.shape[0], LANE), _round_up(w.shape[1], LANE)
        prep["layers"].append(dict(
            w=_pad_to(w, (cin_p, cout_p)).astype(jnp.bfloat16),
            b=_pad_to(b, (1, cout_p)),
            gamma=_pad_to(g, (1, cout_p)),
            beta=_pad_to(be, (1, cout_p)),
        ))
    (w1, b1), (w2, b2) = params["fc1"], params["fc2"]
    c_p, c2_p = _round_up(w1.shape[0], LANE), _round_up(w1.shape[1], LANE)
    o_p = _round_up(w2.shape[1], LANE)
    prep["fc1"] = (_pad_to(w1, (c_p, c2_p)).astype(jnp.bfloat16), _pad_to(b1, (1, c2_p)))
    prep["fc2"] = (_pad_to(w2, (c2_p, o_p)).astype(jnp.bfloat16), _pad_to(b2, (1, o_p)))
    prep["out_dim"] = params["fc2"][0].shape[1]
    return prep


def gcn_forward(prep, a_pad, x, n_true, tile=TILE):
    """Tiled forward pass. a_pad / prep are pre-padded, pre-cast (one-time)."""
    n_pad = a_pad.shape[0]
    cin0_p = _round_up(x.shape[1], LANE)
    h = _pad_to(x, (n_pad, cin0_p))                   # f32; padded rows are zero
    s = jnp.ones((1, cin0_p), jnp.float32)            # dummy, unused for first layer
    t = jnp.zeros((1, cin0_p), jnp.float32)

    for l, layer in enumerate(prep["layers"]):
        z, ssum, ssq = _gcn_layer(a_pad, h, s, t, layer["w"], layer["b"],
                                  n_true=n_true, first_layer=(l == 0),
                                  tm=tile, tk=tile)
        # Global BN stats across row tiles (tiny (n_row_tiles, C) reduction),
        # divided by the TRUE node count (padded rows masked in-kernel), folded
        # into a single scale/shift applied inside the NEXT kernel.
        mean = jnp.sum(ssum[:, 0, :], axis=0) / n_true
        var = jnp.maximum(jnp.sum(ssq[:, 0, :], axis=0) / n_true - mean * mean, 0.0)
        s = layer["gamma"] * jax.lax.rsqrt(var + BN_EPS)
        t = layer["beta"] - mean * s
        h = z

    (w1, b1), (w2, b2) = prep["fc1"], prep["fc2"]
    out = _gcn_head(h, s, t, w1, b1, w2, b2, tm=tile)
    return out[:n_true, :prep["out_dim"]]


# ----------------------------------- main ------------------------------------ #

if __name__ == "__main__":
    num_nodes = 16
    input_dim = 8
    hidden_dims = [32, 32]
    output_dim = 4
    num_edges = 32

    key = jax.random.PRNGKey(0)
    key, kx, ke = jax.random.split(key, 3)

    x = jax.random.normal(kx, (num_nodes, input_dim), jnp.float32)

    # deterministic undirected random graph
    src = jax.random.randint(ke, (num_edges,), 0, num_nodes)
    dst = jax.random.randint(jax.random.fold_in(ke, 1), (num_edges,), 0, num_nodes)
    edge_index = jnp.stack([jnp.concatenate([src, dst]),
                            jnp.concatenate([dst, src])], axis=0)

    a_hat = build_normalized_adjacency(edge_index, num_nodes)
    params = init_params(key, input_dim, hidden_dims, output_dim)

    # one-time prep (NOT per forward call): pad + cast weights and adjacency
    prep = prepare_params(params)
    a_pad = prepare_adjacency(a_hat)

    fwd = jax.jit(lambda xx: gcn_forward(prep, a_pad, xx, num_nodes))
    out = jax.block_until_ready(fwd(x))

    assert out.shape == (num_nodes, output_dim)
    assert bool(jnp.all(jnp.isfinite(out)))
    print("KERNEL_OK")
</pallas_src>

<mosaic_0001>
module attributes {stable_mosaic.version = 11 : i64} {
  func.func @_gcn_layer_kernel(%arg0: i32, %arg1: i32, %arg2: memref<256x256xbf16, #tpu.memory_space<vmem>>, %arg3: memref<256x128xf32, #tpu.memory_space<vmem>>, %arg4: memref<1x128xf32, #tpu.memory_space<vmem>>, %arg5: memref<1x128xf32, #tpu.memory_space<vmem>>, %arg6: memref<128x128xbf16, #tpu.memory_space<vmem>>, %arg7: memref<1x128xf32, #tpu.memory_space<vmem>>, %arg8: memref<256x128xf32, #tpu.memory_space<vmem>>, %arg9: memref<1x1x128xf32, #tpu.memory_space<vmem>>, %arg10: memref<1x1x128xf32, #tpu.memory_space<vmem>>) attributes {dimension_semantics = [#tpu.dimension_semantics<parallel>, #tpu.dimension_semantics<arbitrary>], iteration_bounds = array<i64: 1, 1>, scalar_prefetch = 0 : i64, scratch_operands = 0 : i64, tpu.core_type = #tpu.core_type<tc>, window_params = [{transform_indices = @transform_0, window_bounds = array<i64: 256, 256>}, {transform_indices = @transform_1, window_bounds = array<i64: 256, 128>}, {pipeline_mode = #tpu.pipeline_mode<synchronous>, transform_indices = @transform_2, window_bounds = array<i64: 1, 128>}, {pipeline_mode = #tpu.pipeline_mode<synchronous>, transform_indices = @transform_3, window_bounds = array<i64: 1, 128>}, {pipeline_mode = #tpu.pipeline_mode<synchronous>, transform_indices = @transform_4, window_bounds = array<i64: 128, 128>}, {pipeline_mode = #tpu.pipeline_mode<synchronous>, transform_indices = @transform_5, window_bounds = array<i64: 1, 128>}, {transform_indices = @transform_6, window_bounds = array<i64: 256, 128>}, {transform_indices = @transform_7, window_bounds = array<i64: 1, 1, 128>}, {transform_indices = @transform_8, window_bounds = array<i64: 1, 1, 128>}]} {
    %c0 = arith.constant 0 : index
    %c0_0 = arith.constant 0 : index
    %0 = vector.load %arg3[%c0, %c0_0] : memref<256x128xf32, #tpu.memory_space<vmem>>, vector<256x128xf32>
    %c0_1 = arith.constant 0 : index
    %c0_2 = arith.constant 0 : index
    %1 = vector.load %arg4[%c0_1, %c0_2] : memref<1x128xf32, #tpu.memory_space<vmem>>, vector<1x128xf32>
    %2 = vector.broadcast %1 : vector<1x128xf32> to vector<256x128xf32>
    %3 = arith.mulf %0, %2 : vector<256x128xf32>
    %c0_3 = arith.constant 0 : index
    %c0_4 = arith.constant 0 : index
    %4 = vector.load %arg5[%c0_3, %c0_4] : memref<1x128xf32, #tpu.memory_space<vmem>>, vector<1x128xf32>
    %5 = vector.broadcast %4 : vector<1x128xf32> to vector<256x128xf32>
    %6 = arith.addf %3, %5 : vector<256x128xf32>
    %cst = arith.constant 0.000000e+00 : f32
    %7 = vector.broadcast %cst : f32 to vector<256x128xf32>
    %8 = arith.maximumf %6, %7 : vector<256x128xf32>
    %9 = arith.truncf %8 : vector<256x128xf32> to vector<256x128xbf16>
    %c0_5 = arith.constant 0 : index
    %c0_6 = arith.constant 0 : index
    %10 = vector.load %arg6[%c0_5, %c0_6] : memref<128x128xbf16, #tpu.memory_space<vmem>>, vector<128x128xbf16>
    %cst_7 = arith.constant dense<0.000000e+00> : vector<256x128xf32>
    %11 = tpu.matmul %9, %10, %cst_7 {dimension_numbers = #tpu.dot_dimension_numbers<[1], [0], [0], [1], [0, 0, 1, 1], [], []>} : vector<256x128xbf16>, vector<128x128xbf16>, vector<256x128xf32> -> vector<256x128xf32>
    %c0_i32 = arith.constant 0 : i32
    %12 = arith.cmpi eq, %arg1, %c0_i32 : i32
    %13 = arith.extui %12 : i1 to i32
    %c0_i32_8 = arith.constant 0 : i32
    %14 = arith.cmpi ne, %13, %c0_i32_8 : i32
    scf.if %14 {
      %cst_18 = arith.constant 0.000000e+00 : f32
      %24 = vector.broadcast %cst_18 : f32 to vector<256x128xf32>
      %c0_19 = arith.constant 0 : index
      %c0_20 = arith.constant 0 : index
      %25 = vector.load %arg8[%c0_19, %c0_20] : memref<256x128xf32, #tpu.memory_space<vmem>>, vector<256x128xf32>
      tpu.vector_store %arg8[%c0_19, %c0_20], %24 {strides = array<i32>} : memref<256x128xf32, #tpu.memory_space<vmem>>, vector<256x128xf32>,
    } else {
    }
    %c0_9 = arith.constant 0 : index
    %c0_10 = arith.constant 0 : index
    %15 = vector.load %arg8[%c0_9, %c0_10] : memref<256x128xf32, #tpu.memory_space<vmem>>, vector<256x128xf32>
    %c0_11 = arith.constant 0 : index
    %c0_12 = arith.constant 0 : index
    %16 = vector.load %arg2[%c0_11, %c0_12] : memref<256x256xbf16, #tpu.memory_space<vmem>>, vector<256x256xbf16>
    %17 = arith.truncf %11 : vector<256x128xf32> to vector<256x128xbf16>
    %cst_13 = arith.constant dense<0.000000e+00> : vector<256x128xf32>
    %18 = tpu.matmul %16, %17, %cst_13 {dimension_numbers = #tpu.dot_dimension_numbers<[1], [0], [0], [1], [0, 0, 1, 1], [], []>} : vector<256x256xbf16>, vector<256x128xbf16>, vector<256x128xf32> -> vector<256x128xf32>
    %19 = arith.addf %15, %18 : vector<256x128xf32>
    %c0_14 = arith.constant 0 : index
    %c0_15 = arith.constant 0 : index
    %20 = vector.load %arg8[%c0_14, %c0_15] : memref<256x128xf32, #tpu.memory_space<vmem>>, vector<256x128xf32>
    tpu.vector_store %arg8[%c0_14, %c0_15], %19 {strides = array<i32>} : memref<256x128xf32, #tpu.memory_space<vmem>>, vector<256x128xf32>,
    %c0_i32_16 = arith.constant 0 : i32
    %21 = arith.cmpi eq, %arg1, %c0_i32_16 : i32
    %22 = arith.extui %21 : i1 to i32
    %c0_i32_17 = arith.constant 0 : i32
    %23 = arith.cmpi ne, %22, %c0_i32_17 : i32
    scf.if %23 {
      %c256_i32 = arith.constant 256 : i32
      %24 = arith.muli %arg0, %c256_i32 : i32
      %25 = tpu.iota {dimensions = array<i32: 0>} : vector<256x1xi32>
      %26 = vector.broadcast %24 : i32 to vector<256x1xi32>
      %27 = arith.addi %26, %25 : vector<256x1xi32>
      %c16_i32 = arith.constant 16 : i32
      %28 = vector.broadcast %c16_i32 : i32 to vector<256x1xi32>
      %29 = arith.cmpi slt, %27, %28 : vector<256x1xi32>
      %c0_18 = arith.constant 0 : index
      %c0_19 = arith.constant 0 : index
      %30 = vector.load %arg8[%c0_18, %c0_19] : memref<256x128xf32, #tpu.memory_space<vmem>>, vector<256x128xf32>
      %c0_20 = arith.constant 0 : index
      %c0_21 = arith.constant 0 : index
      %31 = vector.load %arg7[%c0_20, %c0_21] : memref<1x128xf32, #tpu.memory_space<vmem>>, vector<1x128xf32>
      %32 = vector.broadcast %31 : vector<1x128xf32> to vector<256x128xf32>
      %33 = arith.addf %30, %32 : vector<256x128xf32>
      %cst_22 = arith.constant 0.000000e+00 : f32
      %34 = vector.shape_cast %29 : vector<256x1xi1> to vector<256x1xi1>
      %35 = vector.broadcast %34 : vector<256x1xi1> to vector<256x128xi1>
      %36 = vector.broadcast %cst_22 : f32 to vector<256x128xf32>
      %37 = arith.select %35, %33, %36 : vector<256x128xi1>, vector<256x128xf32>
      %c0_23 = arith.constant 0 : index
      %c0_24 = arith.constant 0 : index
      %38 = vector.load %arg8[%c0_23, %c0_24] : memref<256x128xf32, #tpu.memory_space<vmem>>, vector<256x128xf32>
      tpu.vector_store %arg8[%c0_23, %c0_24], %37 {strides = array<i32>} : memref<256x128xf32, #tpu.memory_space<vmem>>, vector<256x128xf32>,
      %cst_25 = arith.constant dense<0.000000e+00> : vector<128xf32>
      %39 = vector.multi_reduction <add>, %37, %cst_25 [0] : vector<256x128xf32> to vector<128xf32>
      %40 = vector.shape_cast %39 : vector<128xf32> to vector<1x128xf32>
      %41 = vector.shape_cast %40 : vector<1x128xf32> to vector<1x1x128xf32>
      %c0_26 = arith.constant 0 : index
      %c0_27 = arith.constant 0 : index
      %c0_28 = arith.constant 0 : index
      %42 = vector.load %arg9[%c0_26, %c0_27, %c0_28] : memref<1x1x128xf32, #tpu.memory_space<vmem>>, vector<1x1x128xf32>
      tpu.vector_store %arg9[%c0_26, %c0_27, %c0_28], %41 {strides = array<i32>} : memref<1x1x128xf32, #tpu.memory_space<vmem>>, vector<1x1x128xf32>,
      %43 = arith.mulf %37, %37 : vector<256x128xf32>
      %cst_29 = arith.constant dense<0.000000e+00> : vector<128xf32>
      %44 = vector.multi_reduction <add>, %43, %cst_29 [0] : vector<256x128xf32> to vector<128xf32>
      %45 = vector.shape_cast %44 : vector<128xf32> to vector<1x128xf32>
      %46 = vector.shape_cast %45 : vector<1x128xf32> to vector<1x1x128xf32>
      %c0_30 = arith.constant 0 : index
      %c0_31 = arith.constant 0 : index
      %c0_32 = arith.constant 0 : index
      %47 = vector.load %arg10[%c0_30, %c0_31, %c0_32] : memref<1x1x128xf32, #tpu.memory_space<vmem>>, vector<1x1x128xf32>
      tpu.vector_store %arg10[%c0_30, %c0_31, %c0_32], %46 {strides = array<i32>} : memref<1x1x128xf32, #tpu.memory_space<vmem>>, vector<1x1x128xf32>,
    } else {
    }
    return
  }
  func.func @transform_0(%arg0: i32, %arg1: i32) -> (i32, i32) {
    %c0_i32 = arith.constant 0 : i32
    return %arg0, %arg1 : i32, i32
  }
  func.func @transform_1(%arg0: i32, %arg1: i32) -> (i32, i32) {
    %c0_i32 = arith.constant 0 : i32
    %c0_i32_0 = arith.constant 0 : i32
    return %arg1, %c0_i32 : i32, i32
  }
  func.func @transform_2(%arg0: i32, %arg1: i32) -> (i32, i32) {
    %c0_i32 = arith.constant 0 : i32
    %c0_i32_0 = arith.constant 0 : i32
    %c0_i32_1 = arith.constant 0 : i32
    return %c0_i32, %c0_i32_0 : i32, i32
  }
  func.func @transform_3(%arg0: i32, %arg1: i32) -> (i32, i32) {
    %c0_i32 = arith.constant 0 : i32
    %c0_i32_0 = arith.constant 0 : i32
    %c0_i32_1 = arith.constant 0 : i32
    return %c0_i32, %c0_i32_0 : i32, i32
  }
  func.func @transform_4(%arg0: i32, %arg1: i32) -> (i32, i32) {
    %c0_i32 = arith.constant 0 : i32
    %c0_i32_0 = arith.constant 0 : i32
    %c0_i32_1 = arith.constant 0 : i32
    return %c0_i32, %c0_i32_0 : i32, i32
  }
  func.func @transform_5(%arg0: i32, %arg1: i32) -> (i32, i32) {
    %c0_i32 = arith.constant 0 : i32
    %c0_i32_0 = arith.constant 0 : i32
    %c0_i32_1 = arith.constant 0 : i32
    return %c0_i32, %c0_i32_0 : i32, i32
  }
  func.func @transform_6(%arg0: i32, %arg1: i32) -> (i32, i32) {
    %c0_i32 = arith.constant 0 : i32
    %c0_i32_0 = arith.constant 0 : i32
    return %arg0, %c0_i32 : i32, i32
  }
  func.func @transform_7(%arg0: i32, %arg1: i32) -> (i32, i32, i32) {
    %c0_i32 = arith.constant 0 : i32
    %c0_i32_0 = arith.constant 0 : i32
    %c0_i32_1 = arith.constant 0 : i32
    return %arg0, %c0_i32, %c0_i32_0 : i32, i32, i32
  }
  func.func @transform_8(%arg0: i32, %arg1: i32) -> (i32, i32, i32) {
    %c0_i32 = arith.constant 0 : i32
    %c0_i32_0 = arith.constant 0 : i32
    %c0_i32_1 = arith.constant 0 : i32
    return %arg0, %c0_i32, %c0_i32_0 : i32, i32, i32
  }
}

module attributes {stable_mosaic.version = 11 : i64} {
  func.func @_gcn_head_kernel(%arg0: i32, %arg1: memref<256x128xf32, #tpu.memory_space<vmem>>, %arg2: memref<1x128xf32, #tpu.memory_space<vmem>>, %arg3: memref<1x128xf32, #tpu.memory_space<vmem>>, %arg4: memref<128x128xbf16, #tpu.memory_space<vmem>>, %arg5: memref<1x128xf32, #tpu.memory_space<vmem>>, %arg6: memref<128x128xbf16, #tpu.memory_space<vmem>>, %arg7: memref<1x128xf32, #tpu.memory_space<vmem>>, %arg8: memref<256x128xf32, #tpu.memory_space<vmem>>) attributes {dimension_semantics = [#tpu.dimension_semantics<parallel>], iteration_bounds = array<i64: 1>, scalar_prefetch = 0 : i64, scratch_operands = 0 : i64, tpu.core_type = #tpu.core_type<tc>, window_params = [{transform_indices = @transform_0, window_bounds = array<i64: 256, 128>}, {pipeline_mode = #tpu.pipeline_mode<synchronous>, transform_indices = @transform_1, window_bounds = array<i64: 1, 128>}, {pipeline_mode = #tpu.pipeline_mode<synchronous>, transform_indices = @transform_2, window_bounds = array<i64: 1, 128>}, {pipeline_mode = #tpu.pipeline_mode<synchronous>, transform_indices = @transform_3, window_bounds = array<i64: 128, 128>}, {pipeline_mode = #tpu.pipeline_mode<synchronous>, transform_indices = @transform_4, window_bounds = array<i64: 1, 128>}, {pipeline_mode = #tpu.pipeline_mode<synchronous>, transform_indices = @transform_5, window_bounds = array<i64: 128, 128>}, {pipeline_mode = #tpu.pipeline_mode<synchronous>, transform_indices = @transform_6, window_bounds = array<i64: 1, 128>}, {transform_indices = @transform_7, window_bounds = array<i64: 256, 128>}]} {
    %c0 = arith.constant 0 : index
    %c0_0 = arith.constant 0 : index
    %0 = vector.load %arg1[%c0, %c0_0] : memref<256x128xf32, #tpu.memory_space<vmem>>, vector<256x128xf32>
    %c0_1 = arith.constant 0 : index
    %c0_2 = arith.constant 0 : index
    %1 = vector.load %arg2[%c0_1, %c0_2] : memref<1x128xf32, #tpu.memory_space<vmem>>, vector<1x128xf32>
    %2 = vector.broadcast %1 : vector<1x128xf32> to vector<256x128xf32>
    %3 = arith.mulf %0, %2 : vector<256x128xf32>
    %c0_3 = arith.constant 0 : index
    %c0_4 = arith.constant 0 : index
    %4 = vector.load %arg3[%c0_3, %c0_4] : memref<1x128xf32, #tpu.memory_space<vmem>>, vector<1x128xf32>
    %5 = vector.broadcast %4 : vector<1x128xf32> to vector<256x128xf32>
    %6 = arith.addf %3, %5 : vector<256x128xf32>
    %cst = arith.constant 0.000000e+00 : f32
    %7 = vector.broadcast %cst : f32 to vector<256x128xf32>
    %8 = arith.maximumf %6, %7 : vector<256x128xf32>
    %9 = arith.truncf %8 : vector<256x128xf32> to vector<256x128xbf16>
    %c0_5 = arith.constant 0 : index
    %c0_6 = arith.constant 0 : index
    %10 = vector.load %arg4[%c0_5, %c0_6] : memref<128x128xbf16, #tpu.memory_space<vmem>>, vector<128x128xbf16>
    %cst_7 = arith.constant dense<0.000000e+00> : vector<256x128xf32>
    %11 = tpu.matmul %9, %10, %cst_7 {dimension_numbers = #tpu.dot_dimension_numbers<[1], [0], [0], [1], [0, 0, 1, 1], [], []>} : vector<256x128xbf16>, vector<128x128xbf16>, vector<256x128xf32> -> vector<256x128xf32>
    %c0_8 = arith.constant 0 : index
    %c0_9 = arith.constant 0 : index
    %12 = vector.load %arg5[%c0_8, %c0_9] : memref<1x128xf32, #tpu.memory_space<vmem>>, vector<1x128xf32>
    %13 = vector.broadcast %12 : vector<1x128xf32> to vector<256x128xf32>
    %14 = arith.addf %11, %13 : vector<256x128xf32>
    %cst_10 = arith.constant 0.000000e+00 : f32
    %15 = vector.broadcast %cst_10 : f32 to vector<256x128xf32>
    %16 = arith.maximumf %14, %15 : vector<256x128xf32>
    %17 = arith.truncf %16 : vector<256x128xf32> to vector<256x128xbf16>
    %c0_11 = arith.constant 0 : index
    %c0_12 = arith.constant 0 : index
    %18 = vector.load %arg6[%c0_11, %c0_12] : memref<128x128xbf16, #tpu.memory_space<vmem>>, vector<128x128xbf16>
    %cst_13 = arith.constant dense<0.000000e+00> : vector<256x128xf32>
    %19 = tpu.matmul %17, %18, %cst_13 {dimension_numbers = #tpu.dot_dimension_numbers<[1], [0], [0], [1], [0, 0, 1, 1], [], []>} : vector<256x128xbf16>, vector<128x128xbf16>, vector<256x128xf32> -> vector<256x128xf32>
    %c0_14 = arith.constant 0 : index
    %c0_15 = arith.constant 0 : index
    %20 = vector.load %arg7[%c0_14, %c0_15] : memref<1x128xf32, #tpu.memory_space<vmem>>, vector<1x128xf32>
    %21 = vector.broadcast %20 : vector<1x128xf32> to vector<256x128xf32>
    %22 = arith.addf %19, %21 : vector<256x128xf32>
    %23 = arith.negf %22 : vector<256x128xf32>
    %24 = math.exp %23 : vector<256x128xf32>
    %cst_16 = arith.constant 1.000000e+00 : f32
    %25 = vector.broadcast %cst_16 : f32 to vector<256x128xf32>
    %26 = arith.addf %25, %24 : vector<256x128xf32>
    %27 = arith.divf %25, %26 : vector<256x128xf32>
    %c0_17 = arith.constant 0 : index
    %c0_18 = arith.constant 0 : index
    %28 = vector.load %arg8[%c0_17, %c0_18] : memref<256x128xf32, #tpu.memory_space<vmem>>, vector<256x128xf32>
    tpu.vector_store %arg8[%c0_17, %c0_18], %27 {strides = array<i32>} : memref<256x128xf32, #tpu.memory_space<vmem>>, vector<256x128xf32>,
    return
  }
  func.func @transform_0(%arg0: i32) -> (i32, i32) {
    %c0_i32 = arith.constant 0 : i32
    %c0_i32_0 = arith.constant 0 : i32
    return %arg0, %c0_i32 : i32, i32
  }
  func.func @transform_1(%arg0: i32) -> (i32, i32) {
    %c0_i32 = arith.constant 0 : i32
    %c0_i32_0 = arith.constant 0 : i32
    %c0_i32_1 = arith.constant 0 : i32
    return %c0_i32, %c0_i32_0 : i32, i32
  }
  func.func @transform_2(%arg0: i32) -> (i32, i32) {
    %c0_i32 = arith.constant 0 : i32
    %c0_i32_0 = arith.constant 0 : i32
    %c0_i32_1 = arith.constant 0 : i32
    return %c0_i32, %c0_i32_0 : i32, i32
  }
  func.func @transform_3(%arg0: i32) -> (i32, i32) {
    %c0_i32 = arith.constant 0 : i32
    %c0_i32_0 = arith.constant 0 : i32
    %c0_i32_1 = arith.constant 0 : i32
    return %c0_i32, %c0_i32_0 : i32, i32
  }
  func.func @transform_4(%arg0: i32) -> (i32, i32) {
    %c0_i32 = arith.constant 0 : i32
    %c0_i32_0 = arith.constant 0 : i32
    %c0_i32_1 = arith.constant 0 : i32
    return %c0_i32, %c0_i32_0 : i32, i32
  }
  func.func @transform_5(%arg0: i32) -> (i32, i32) {
    %c0_i32 = arith.constant 0 : i32
    %c0_i32_0 = arith.constant 0 : i32
    %c0_i32_1 = arith.constant 0 : i32
    return %c0_i32, %c0_i32_0 : i32, i32
  }
  func.func @transform_6(%arg0: i32) -> (i32, i32) {
    %c0_i32 = arith.constant 0 : i32
    %c0_i32_0 = arith.constant 0 : i32
    %c0_i32_1 = arith.constant 0 : i32
    return %c0_i32, %c0_i32_0 : i32, i32
  }
  func.func @transform_7(%arg0: i32) -> (i32, i32) {
    %c0_i32 = arith.constant 0 : i32
    %c0_i32_0 = arith.constant 0 : i32
    return %arg0, %c0_i32 : i32, i32
  }
}

module attributes {stable_mosaic.version = 11 : i64} {
  func.func @_gcn_layer_kernel(%arg0: i32, %arg1: i32, %arg2: memref<256x256xbf16, #tpu.memory_space<vmem>>, %arg3: memref<256x128xf32, #tpu.memory_space<vmem>>, %arg4: memref<1x128xf32, #tpu.memory_space<vmem>>, %arg5: memref<1x128xf32, #tpu.memory_space<vmem>>, %arg6: memref<128x128xbf16, #tpu.memory_space<vmem>>, %arg7: memref<1x128xf32, #tpu.memory_space<vmem>>, %arg8: memref<256x128xf32, #tpu.memory_space<vmem>>, %arg9: memref<1x1x128xf32, #tpu.memory_space<vmem>>, %arg10: memref<1x1x128xf32, #tpu.memory_space<vmem>>) attributes {dimension_semantics = [#tpu.dimension_semantics<parallel>, #tpu.dimension_semantics<arbitrary>], iteration_bounds = array<i64: 1, 1>, scalar_prefetch = 0 : i64, scratch_operands = 0 : i64, tpu.core_type = #tpu.core_type<tc>, window_params = [{transform_indices = @transform_0, window_bounds = array<i64: 256, 256>}, {transform_indices = @transform_1, window_bounds = array<i64: 256, 128>}, {pipeline_mode = #tpu.pipeline_mode<synchronous>, transform_indices = @transform_2, window_bounds = array<i64: 1, 128>}, {pipeline_mode = #tpu.pipeline_mode<synchronous>, transform_indices = @transform_3, window_bounds = array<i64: 1, 128>}, {pipeline_mode = #tpu.pipeline_mode<synchronous>, transform_indices = @transform_4, window_bounds = array<i64: 128, 128>}, {pipeline_mode = #tpu.pipeline_mode<synchronous>, transform_indices = @transform_5, window_bounds = array<i64: 1, 128>}, {transform_indices = @transform_6, window_bounds = array<i64: 256, 128>}, {transform_indices = @transform_7, window_bounds = array<i64: 1, 1, 128>}, {transform_indices = @transform_8, window_bounds = array<i64: 1, 1, 128>}]} {
    %c0 = arith.constant 0 : index
    %c0_0 = arith.constant 0 : index
    %0 = vector.load %arg3[%c0, %c0_0] : memref<256x128xf32, #tpu.memory_space<vmem>>, vector<256x128xf32>
    %1 = arith.truncf %0 : vector<256x128xf32> to vector<256x128xbf16>
    %c0_1 = arith.constant 0 : index
    %c0_2 = arith.constant 0 : index
    %2 = vector.load %arg6[%c0_1, %c0_2] : memref<128x128xbf16, #tpu.memory_space<vmem>>, vector<128x128xbf16>
    %cst = arith.constant dense<0.000000e+00> : vector<256x128xf32>
    %3 = tpu.matmul %1, %2, %cst {dimension_numbers = #tpu.dot_dimension_numbers<[1], [0], [0], [1], [0, 0, 1, 1], [], []>} : vector<256x128xbf16>, vector<128x128xbf16>, vector<256x128xf32> -> vector<256x128xf32>
    %c0_i32 = arith.constant 0 : i32
    %4 = arith.cmpi eq, %arg1, %c0_i32 : i32
    %5 = arith.extui %4 : i1 to i32
    %c0_i32_3 = arith.constant 0 : i32
    %6 = arith.cmpi ne, %5, %c0_i32_3 : i32
    scf.if %6 {
      %cst_13 = arith.constant 0.000000e+00 : f32
      %16 = vector.broadcast %cst_13 : f32 to vector<256x128xf32>
      %c0_14 = arith.constant 0 : index
      %c0_15 = arith.constant 0 : index
      %17 = vector.load %arg8[%c0_14, %c0_15] : memref<256x128xf32, #tpu.memory_space<vmem>>, vector<256x128xf32>
      tpu.vector_store %arg8[%c0_14, %c0_15], %16 {strides = array<i32>} : memref<256x128xf32, #tpu.memory_space<vmem>>, vector<256x128xf32>,
    } else {
    }
    %c0_4 = arith.constant 0 : index
    %c0_5 = arith.constant 0 : index
    %7 = vector.load %arg8[%c0_4, %c0_5] : memref<256x128xf32, #tpu.memory_space<vmem>>, vector<256x128xf32>
    %c0_6 = arith.constant 0 : index
    %c0_7 = arith.constant 0 : index
    %8 = vector.load %arg2[%c0_6, %c0_7] : memref<256x256xbf16, #tpu.memory_space<vmem>>, vector<256x256xbf16>
    %9 = arith.truncf %3 : vector<256x128xf32> to vector<256x128xbf16>
    %cst_8 = arith.constant dense<0.000000e+00> : vector<256x128xf32>
    %10 = tpu.matmul %8, %9, %cst_8 {dimension_numbers = #tpu.dot_dimension_numbers<[1], [0], [0], [1], [0, 0, 1, 1], [], []>} : vector<256x256xbf16>, vector<256x128xbf16>, vector<256x128xf32> -> vector<256x128xf32>
    %11 = arith.addf %7, %10 : vector<256x128xf32>
    %c0_9 = arith.constant 0 : index
    %c0_10 = arith.constant 0 : index
    %12 = vector.load %arg8[%c0_9, %c0_10] : memref<256x128xf32, #tpu.memory_space<vmem>>, vector<256x128xf32>
    tpu.vector_store %arg8[%c0_9, %c0_10], %11 {strides = array<i32>} : memref<256x128xf32, #tpu.memory_space<vmem>>, vector<256x128xf32>,
    %c0_i32_11 = arith.constant 0 : i32
    %13 = arith.cmpi eq, %arg1, %c0_i32_11 : i32
    %14 = arith.extui %13 : i1 to i32
    %c0_i32_12 = arith.constant 0 : i32
    %15 = arith.cmpi ne, %14, %c0_i32_12 : i32
    scf.if %15 {
      %c256_i32 = arith.constant 256 : i32
      %16 = arith.muli %arg0, %c256_i32 : i32
      %17 = tpu.iota {dimensions = array<i32: 0>} : vector<256x1xi32>
      %18 = vector.broadcast %16 : i32 to vector<256x1xi32>
      %19 = arith.addi %18, %17 : vector<256x1xi32>
      %c16_i32 = arith.constant 16 : i32
      %20 = vector.broadcast %c16_i32 : i32 to vector<256x1xi32>
      %21 = arith.cmpi slt, %19, %20 : vector<256x1xi32>
      %c0_13 = arith.constant 0 : index
      %c0_14 = arith.constant 0 : index
      %22 = vector.load %arg8[%c0_13, %c0_14] : memref<256x128xf32, #tpu.memory_space<vmem>>, vector<256x128xf32>
      %c0_15 = arith.constant 0 : index
      %c0_16 = arith.constant 0 : index
      %23 = vector.load %arg7[%c0_15, %c0_16] : memref<1x128xf32, #tpu.memory_space<vmem>>, vector<1x128xf32>
      %24 = vector.broadcast %23 : vector<1x128xf32> to vector<256x128xf32>
      %25 = arith.addf %22, %24 : vector<256x128xf32>
      %cst_17 = arith.constant 0.000000e+00 : f32
      %26 = vector.shape_cast %21 : vector<256x1xi1> to vector<256x1xi1>
      %27 = vector.broadcast %26 : vector<256x1xi1> to vector<256x128xi1>
      %28 = vector.broadcast %cst_17 : f32 to vector<256x128xf32>
      %29 = arith.select %27, %25, %28 : vector<256x128xi1>, vector<256x128xf32>
      %c0_18 = arith.constant 0 : index
      %c0_19 = arith.constant 0 : index
      %30 = vector.load %arg8[%c0_18, %c0_19] : memref<256x128xf32, #tpu.memory_space<vmem>>, vector<256x128xf32>
      tpu.vector_store %arg8[%c0_18, %c0_19], %29 {strides = array<i32>} : memref<256x128xf32, #tpu.memory_space<vmem>>, vector<256x128xf32>,
      %cst_20 = arith.constant dense<0.000000e+00> : vector<128xf32>
      %31 = vector.multi_reduction <add>, %29, %cst_20 [0] : vector<256x128xf32> to vector<128xf32>
      %32 = vector.shape_cast %31 : vector<128xf32> to vector<1x128xf32>
      %33 = vector.shape_cast %32 : vector<1x128xf32> to vector<1x1x128xf32>
      %c0_21 = arith.constant 0 : index
      %c0_22 = arith.constant 0 : index
      %c0_23 = arith.constant 0 : index
      %34 = vector.load %arg9[%c0_21, %c0_22, %c0_23] : memref<1x1x128xf32, #tpu.memory_space<vmem>>, vector<1x1x128xf32>
      tpu.vector_store %arg9[%c0_21, %c0_22, %c0_23], %33 {strides = array<i32>} : memref<1x1x128xf32, #tpu.memory_space<vmem>>, vector<1x1x128xf32>,
      %35 = arith.mulf %29, %29 : vector<256x128xf32>
      %cst_24 = arith.constant dense<0.000000e+00> : vector<128xf32>
      %36 = vector.multi_reduction <add>, %35, %cst_24 [0] : vector<256x128xf32> to vector<128xf32>
      %37 = vector.shape_cast %36 : vector<128xf32> to vector<1x128xf32>
      %38 = vector.shape_cast %37 : vector<1x128xf32> to vector<1x1x128xf32>
      %c0_25 = arith.constant 0 : index
      %c0_26 = arith.constant 0 : index
      %c0_27 = arith.constant 0 : index
      %39 = vector.load %arg10[%c0_25, %c0_26, %c0_27] : memref<1x1x128xf32, #tpu.memory_space<vmem>>, vector<1x1x128xf32>
      tpu.vector_store %arg10[%c0_25, %c0_26, %c0_27], %38 {strides = array<i32>} : memref<1x1x128xf32, #tpu.memory_space<vmem>>, vector<1x1x128xf32>,
    } else {
    }
    return
  }
  func.func @transform_0(%arg0: i32, %arg1: i32) -> (i32, i32) {
    %c0_i32 = arith.constant 0 : i32
    return %arg0, %arg1 : i32, i32
  }
  func.func @transform_1(%arg0: i32, %arg1: i32) -> (i32, i32) {
    %c0_i32 = arith.constant 0 : i32
    %c0_i32_0 = arith.constant 0 : i32
    return %arg1, %c0_i32 : i32, i32
  }
  func.func @transform_2(%arg0: i32, %arg1: i32) -> (i32, i32) {
    %c0_i32 = arith.constant 0 : i32
    %c0_i32_0 = arith.constant 0 : i32
    %c0_i32_1 = arith.constant 0 : i32
    return %c0_i32, %c0_i32_0 : i32, i32
  }
  func.func @transform_3(%arg0: i32, %arg1: i32) -> (i32, i32) {
    %c0_i32 = arith.constant 0 : i32
    %c0_i32_0 = arith.constant 0 : i32
    %c0_i32_1 = arith.constant 0 : i32
    return %c0_i32, %c0_i32_0 : i32, i32
  }
  func.func @transform_4(%arg0: i32, %arg1: i32) -> (i32, i32) {
    %c0_i32 = arith.constant 0 : i32
    %c0_i32_0 = arith.constant 0 : i32
    %c0_i32_1 = arith.constant 0 : i32
    return %c0_i32, %c0_i32_0 : i32, i32
  }
  func.func @transform_5(%arg0: i32, %arg1: i32) -> (i32, i32) {
    %c0_i32 = arith.constant 0 : i32
    %c0_i32_0 = arith.constant 0 : i32
    %c0_i32_1 = arith.constant 0 : i32
    return %c0_i32, %c0_i32_0 : i32, i32
  }
  func.func @transform_6(%arg0: i32, %arg1: i32) -> (i32, i32) {
    %c0_i32 = arith.constant 0 : i32
    %c0_i32_0 = arith.constant 0 : i32
    return %arg0, %c0_i32 : i32, i32
  }
  func.func @transform_7(%arg0: i32, %arg1: i32) -> (i32, i32, i32) {
    %c0_i32 = arith.constant 0 : i32
    %c0_i32_0 = arith.constant 0 : i32
    %c0_i32_1 = arith.constant 0 : i32
    return %arg0, %c0_i32, %c0_i32_0 : i32, i32, i32
  }
  func.func @transform_8(%arg0: i32, %arg1: i32) -> (i32, i32, i32) {
    %c0_i32 = arith.constant 0 : i32
    %c0_i32_0 = arith.constant 0 : i32
    %c0_i32_1 = arith.constant 0 : i32
    return %arg0, %c0_i32, %c0_i32_0 : i32, i32, i32
  }
}

</mosaic_0001>

<bundles_post_ra>
// kernel: _lambda_.7
= control target key start
LH: loop header
LB: loop body
LE: loop exit
PB: predicated region body
PF: predicated region fallthrough
CT: control target
= control target key end

     0   :  { %s1702_s3 = inlined_call_operand.vmem [shape: bf16[128,128], index: 3, kind: input, shape index: {}]   ;;  %s1703_s0 = inlined_call_operand.vmem [shape: f32[256,128], index: 0, kind: input, shape index: {}]   ;;  %s1704_s1 = inlined_call_operand.vmem [shape: f32[1,128], index: 1, kind: input, shape index: {}]   ;;  %s1705_s2 = inlined_call_operand.vmem [shape: f32[1,128], index: 2, kind: input, shape index: {}]   ;;  %s1706_s5 = inlined_call_operand.vmem [shape: bf16[128,128], index: 5, kind: input, shape index: {}]   ;;  %s1707_s4 = inlined_call_operand.vmem [shape: f32[1,128], index: 4, kind: input, shape index: {}, may-alias: {4,6}]   ;;  %s1708_s6 = inlined_call_operand.vmem [shape: f32[1,128], index: 6, kind: input, shape index: {}, may-alias: {4,6}]   ;;  %s1709_s7 = inlined_call_operand.vmem [shape: f32[256,128], index: 7, kind: output, shape index: {}]  }
   0x1   :  { %v1121_v0 = vld [vmem:[%s1702_s3] sm:$0xff]   ;;  %v1122_v1 = vld [vmem:[%s1702_s3 + $0x8] sm:$0xff]   ;;  %v1123_v2 = vld [vmem:[%s1702_s3 + $0x10] sm:$0xff]  }
   0x2   :  { %1025 = vmatprep.subr.bf16.mxu0 %v1121_v0  ;;  %v1124_v3 = vld [vmem:[%s1702_s3 + $0x18] sm:$0xff]   ;;  %v27_v4 = vld [vmem:[%s1703_s0] sm:$0xff]  ;;  %v28_v5 = vld [vmem:[%s1703_s0 + $0x8] sm:$0xff] }
   0x3   :  { %1026 = vmatpush3.bf16.msra.mxu0 %v1121_v0  ;;  %v1326_v6 = vld [vmem:[%s1704_s1] ss:$0 sm:$0xff]  ;;  %v29_v13 = vld [vmem:[%s1703_s0 + $0x10] sm:$0xff]  ;;  %v30_v16 = vld [vmem:[%s1703_s0 + $0x18] sm:$0xff] }
   0x4   :  { %1027 = vmatprep.subr.bf16.mxu0 %v1122_v1  ;;  %v66_v7 = vmul.f32 %v1326_v6, %v27_v4  ;;  %v67_v8 = vmul.f32 %v1326_v6, %v28_v5  ;;  %v1333_v9 = vld [vmem:[%s1705_s2] ss:$0 sm:$0xff]  ;;  %v32_v18 = vld [vmem:[%s1703_s0 + $0x28] sm:$0xff]  ;;  %v68_v20 = vmul.f32 %v1326_v6, %v29_v13  ;;  %v69_v22 = vmul.f32 %v1326_v6, %v30_v16  ;;  %v1127_v25 = vld [vmem:[%s1702_s3 + $0x30] sm:$0xff]  }
   0x5   :  { %v1125_v12 = vld [vmem:[%s1702_s3 + $0x20] sm:$0xff]   ;;  %v1126_v21 = vld [vmem:[%s1702_s3 + $0x28] sm:$0xff]   ;;  %v71_v24 = vmul.f32 %v1326_v6, %v32_v18  ;;  %v33_v26 = vld [vmem:[%s1703_s0 + $0x30] sm:$0xff] }
   0x6   :  { %v105_v10 = vadd.f32 %v1333_v9, %v66_v7  ;;  %v106_v11 = vadd.f32 %v1333_v9, %v67_v8  ;;  %v31_v17 = vld [vmem:[%s1703_s0 + $0x20] sm:$0xff]  ;;  %v107_v27 = vadd.f32 %v1333_v9, %v68_v20  ;;  %v34_v28 = vld [vmem:[%s1703_s0 + $0x38] sm:$0xff]  ;;  %v108_v29 = vadd.f32 %v1333_v9, %v69_v22  ;;  %v1130_v33 = vld [vmem:[%s1706_s5 + $0x8] sm:$0xff]  }
   0x7   :  { %1028 = vmatpush3.bf16.msra.mxu0 %v1122_v1  ;;  %v70_v23 = vmul.f32 %v1326_v6, %v31_v17  ;;  %v1129_v30 = vld [vmem:[%s1706_s5] sm:$0xff]   ;;  %v110_v32 = vadd.f32 %v1333_v9, %v71_v24  ;;  %v1128_v34 = vld [vmem:[%s1702_s3 + $0x38] sm:$0xff]   ;;  %v72_v35 = vmul.f32 %v1326_v6, %v33_v26  ;;  %v73_v38 = vmul.f32 %v1326_v6, %v34_v28  ;;  %v36_v39 = vld [vmem:[%s1703_s0 + $0x48] sm:$0xff] }
   0x8   :  { %1029 = vmatprep.subr.bf16.mxu0 %v1123_v2  ;;  %v137_v14 = vmax.f32 %v105_v10, 0.0  ;;  %v138_v15 = vmax.f32 %v106_v11, 0.0  ;;  %v35_v36 = vld [vmem:[%s1703_s0 + $0x40] sm:$0xff]  ;;  %1073 = vmatprep.subr.bf16.mxu1 %v1129_v30  ;;  %v139_v37 = vmax.f32 %v107_v27, 0.0  ;;  %v140_v40 = vmax.f32 %v108_v29, 0.0  ;;  %v1131_v41 = vld [vmem:[%s1706_s5 + $0x10] sm:$0xff]  }
   0x9   :  { %v109_v31 = vadd.f32 %v1333_v9, %v70_v23  ;;  %1074 = vmatpush3.bf16.msra.mxu1 %v1129_v30  ;;  %v142_v43 = vmax.f32 %v110_v32, 0.0  ;;  %v111_v44 = vadd.f32 %v1333_v9, %v72_v35  ;;  %v74_v45 = vmul.f32 %v1326_v6, %v35_v36  ;;  %v37_v48 = vld [vmem:[%s1703_s0 + $0x50] sm:$0xff]  ;;  %v38_v49 = vld [vmem:[%s1703_s0 + $0x58] sm:$0xff]  ;;  %v39_v54 = vld [vmem:[%s1703_s0 + $0x60] sm:$0xff] }
   0xa   :  { %v169_v19 = vpack.c.bf16 %v138_v15, %v137_v14  ;;  %1075 = vmatprep.subr.bf16.mxu1 %v1130_v33  ;;  %v112_v46 = vadd.f32 %v1333_v9, %v73_v38  ;;  %v75_v47 = vmul.f32 %v1326_v6, %v36_v39  ;;  %v53_v50 = vld [vmem:[%s1703_s0 + $0xd0] sm:$0xff]  ;;  %v54_v51 = vld [vmem:[%s1703_s0 + $0xd8] sm:$0xff]  ;;  %v170_v53 = vpack.c.bf16 %v140_v40, %v139_v37  ;;  %v55_v55 = vld [vmem:[%s1703_s0 + $0xe0] sm:$0xff] }
   0xb   :  { %1030 = vmatpush3.bf16.msra.mxu0 %v1123_v2  ;;  %v141_v42 = vmax.f32 %v109_v31, 0.0  ;;  %v1132_v52 = vld [vmem:[%s1706_s5 + $0x18] sm:$0xff]   ;;  %v56_v56 = vld [vmem:[%s1703_s0 + $0xe8] sm:$0xff]  ;;  %v143_v58 = vmax.f32 %v111_v44, 0.0  ;;  %v113_v59 = vadd.f32 %v1333_v9, %v74_v45  ;;  %v76_v60 = vmul.f32 %v1326_v6, %v37_v48  ;;  %v57_v62 = vld [vmem:[%s1703_s0 + $0xf0] sm:$0xff] }
   0xc   :  { %1031 = vmatprep.subr.bf16.mxu0 %v1124_v3  ;;  %1041 = vmatprep.mubr.bf16.mxu0 %v169_v19  ;;  %v40_v61 = vld [vmem:[%s1703_s0 + $0x68] sm:$0xff]  ;;  %v144_v63 = vmax.f32 %v112_v46, 0.0  ;;  %v114_v0 = vadd.f32 %v1333_v9, %v75_v47  ;;  %v92_v1 = vmul.f32 %v1326_v6, %v53_v50  ;;  %v93_v2 = vmul.f32 %v1326_v6, %v54_v51  ;;  %v1133_v10 = vld [vmem:[%s1706_s5 + $0x20] sm:$0xff]   ;;  %v41_v37 = vld [vmem:[%s1703_s0 + $0x70] sm:$0xff] }
   0xd   :  { %1076 = vmatpush3.bf16.msra.mxu1 %v1130_v33  ;;  %v171_v57 = vpack.c.bf16 %v142_v43, %v141_v42  ;;  %v77_v4 = vmul.f32 %v1326_v6, %v38_v49  ;;  %v78_v5 = vmul.f32 %v1326_v6, %v39_v54  ;;  %v94_v7 = vmul.f32 %v1326_v6, %v55_v55  ;;  %v1134_v26 = vld [vmem:[%s1706_s5 + $0x28] sm:$0xff]   ;;  %v42_v38 = vld [vmem:[%s1703_s0 + $0x78] sm:$0xff]  ;;  %v43_v39 = vld [vmem:[%s1703_s0 + $0x80] sm:$0xff] }
   0xe   :  { %1077 = vmatprep.subr.bf16.mxu1 %v1131_v41  ;;  %v95_v8 = vmul.f32 %v1326_v6, %v56_v56  ;;  %v79_v11 = vmul.f32 %v1326_v6, %v40_v61  ;;  %v132_v13 = vadd.f32 %v1333_v9, %v93_v2  ;;  %v96_v14 = vmul.f32 %v1326_v6, %v57_v62  ;;  %v44_v40 = vld [vmem:[%s1703_s0 + $0x88] sm:$0xff]  ;;  %v45_v56 = vld [vmem:[%s1703_s0 + $0x90] sm:$0xff] }
   0xf   :  { %1032 = vmatpush3.bf16.msra.mxu0 %v1124_v3  ;;  %v58_v3 = vld [vmem:[%s1703_s0 + $0xf8] sm:$0xff]  ;;  %v145_v15 = vmax.f32 %v113_v59, 0.0  ;;  %v133_v16 = vadd.f32 %v1333_v9, %v94_v7  ;;  %v146_v19 = vmax.f32 %v114_v0, 0.0  ;;  %v172_v27 = vpack.c.bf16 %v144_v63, %v143_v58  ;;  %v47_v58 = vld [vmem:[%s1703_s0 + $0xa0] sm:$0xff]  ;;  %v48_v59 = vld [vmem:[%s1703_s0 + $0xa8] sm:$0xff] }
  0x10   :  { %1033 = vmatprep.subr.bf16.mxu0 %v1125_v12  ;;  %v134_v17 = vadd.f32 %v1333_v9, %v95_v8  ;;  %v97_v18 = vmul.f32 %v1326_v6, %v58_v3  ;;  %v135_v22 = vadd.f32 %v1333_v9, %v96_v14  ;;  %v115_v30 = vadd.f32 %v1333_v9, %v76_v60  ;;  %v51_v14 = vld [vmem:[%s1703_s0 + $0xc0] sm:$0xff] }
  0x11   :  { %1078 = vmatpush3.bf16.msra.mxu1 %v1131_v41  ;;  %v165_v23 = vmax.f32 %v133_v16, 0.0  ;;  %v116_v31 = vadd.f32 %v1333_v9, %v77_v4  ;;  %v117_v35 = vadd.f32 %v1333_v9, %v78_v5  ;;  %v118_v36 = vadd.f32 %v1333_v9, %v79_v11 }
  0x12   :  { %1079 = vmatprep.subr.bf16.mxu1 %v1132_v52  ;;  %v166_v24 = vmax.f32 %v134_v17, 0.0  ;;  %v167_v29 = vmax.f32 %v135_v22, 0.0  ;;  %v147_v42 = vmax.f32 %v115_v30, 0.0  ;;  %v80_v44 = vmul.f32 %v1326_v6, %v41_v37 }
  0x13   :  { %1034 = vmatpush3.bf16.msra.mxu0 %v1125_v12  ;;  %v131_v12 = vadd.f32 %v1333_v9, %v92_v1  ;;  %v148_v43 = vmax.f32 %v116_v31, 0.0  ;;  %v81_v45 = vmul.f32 %v1326_v6, %v42_v38  ;;  %v149_v46 = vmax.f32 %v117_v35, 0.0 }
  0x14   :  { %1035 = vmatprep.subr.bf16.mxu0 %v1126_v21  ;;  %v1457_v32 = vpack.c.bf16 %v166_v24, %v165_v23  ;;  %v150_v47 = vmax.f32 %v118_v36, 0.0  ;;  %v82_v48 = vmul.f32 %v1326_v6, %v43_v39  ;;  %v83_v49 = vmul.f32 %v1326_v6, %v44_v40 }
  0x15   :  { %v163_v20 = vmax.f32 %v131_v12, 0.0  ;;  %1080 = vmatpush3.bf16.msra.mxu1 %v1132_v52  ;;  %v174_v50 = vpack.c.bf16 %v148_v43, %v147_v42  ;;  %v119_v51 = vadd.f32 %v1333_v9, %v80_v44  ;;  %v120_v52 = vadd.f32 %v1333_v9, %v81_v45  ;;  %v49_v12 = vld [vmem:[%s1703_s0 + $0xb0] sm:$0xff] }
  0x16   :  { %1081 = vmatprep.subr.bf16.mxu1 %v1133_v10  ;;  %v121_v54 = vadd.f32 %v1333_v9, %v82_v48  ;;  %v122_v55 = vadd.f32 %v1333_v9, %v83_v49  ;;  %v84_v62 = vmul.f32 %v1326_v6, %v45_v56  ;;  %v86_v2 = vmul.f32 %v1326_v6, %v47_v58 }
  0x17   :  { %1036 = vmatpush3.bf16.msra.mxu0 %v1126_v21  ;;  %v164_v21 = vmax.f32 %v132_v13, 0.0  ;;  %v151_v60 = vmax.f32 %v119_v51, 0.0  ;;  %v152_v61 = vmax.f32 %v120_v52, 0.0  ;;  %v87_v3 = vmul.f32 %v1326_v6, %v48_v59  ;;  %v50_v13 = vld [vmem:[%s1703_s0 + $0xb8] sm:$0xff] }
  0x18   :  { %1037 = vmatprep.subr.bf16.mxu0 %v1127_v25  ;;  %v153_v0 = vmax.f32 %v121_v54, 0.0  ;;  %v154_v1 = vmax.f32 %v122_v55, 0.0  ;;  %v123_v5 = vadd.f32 %v1333_v9, %v84_v62  ;;  %v90_v22 = vmul.f32 %v1326_v6, %v51_v14 }
  0x19   :  { %v1453_v28 = vpack.c.bf16 %v164_v21, %v163_v20  ;;  %1082 = vmatpush3.bf16.msra.mxu1 %v1133_v10  ;;  %v176_v4 = vpack.c.bf16 %v152_v61, %v151_v60  ;;  %v125_v10 = vadd.f32 %v1333_v9, %v86_v2  ;;  %v126_v11 = vadd.f32 %v1333_v9, %v87_v3 }
  0x1a   :  { %1083 = vmatprep.subr.bf16.mxu1 %v1134_v26  ;;  %v177_v8 = vpack.c.bf16 %v154_v1, %v153_v0  ;;  %v155_v16 = vmax.f32 %v123_v5, 0.0 }
  0x1b   :  { %1038 = vmatpush3.bf16.msra.mxu0 %v1127_v25  ;;  %v136_v25 = vadd.f32 %v1333_v9, %v97_v18  ;;  %v88_v18 = vmul.f32 %v1326_v6, %v49_v12  ;;  %v157_v20 = vmax.f32 %v125_v10, 0.0  ;;  %v158_v21 = vmax.f32 %v126_v11, 0.0 }
  0x1c   :  { %1039 = vmatprep.subr.bf16.mxu0 %v1128_v34 }
  0x1d   :  { %v168_v33 = vmax.f32 %v136_v25, 0.0  ;;  %1084 = vmatpush3.bf16.msra.mxu1 %v1134_v26  ;;  %v127_v25 = vadd.f32 %v1333_v9, %v88_v18 }
  0x1f   :  { %1040 = vmatpush3.bf16.msra.mxu0 %v1128_v34  ;;  %v173_v34 = vpack.c.bf16 %v146_v19, %v145_v15  ;;  %v1473_v41 = vpack.c.bf16 %v168_v33, %v167_v29  ;;  %v52_v15 = vld [vmem:[%s1703_s0 + $0xc8] sm:$0xff]  ;;  %v89_v19 = vmul.f32 %v1326_v6, %v50_v13  ;;  %v129_v29 = vadd.f32 %v1333_v9, %v90_v22 }
  0x20   :  { %v91_v23 = vmul.f32 %v1326_v6, %v52_v15  ;;  %v159_v31 = vmax.f32 %v127_v25, 0.0 }
  0x21   :  { %v128_v26 = vadd.f32 %v1333_v9, %v89_v19 }
  0x22   :  { %1042 = vmatmul.mubr.bf16.vlgmr.msra.gmra.mrb[0].mxu0 %v170_v53  ;;  %v175_v53 = vpack.c.bf16 %v150_v47, %v149_v46  ;;  %v130_v30 = vadd.f32 %v1333_v9, %v91_v23 }
  0x23   :  { %1045 = vmatprep.mubr.bf16.mxu0 %v171_v57  ;;  %v46_v57 = vld [vmem:[%s1703_s0 + $0x98] sm:$0xff]  ;;  %v160_v33 = vmax.f32 %v128_v26, 0.0 }
  0x24   :  { %v85_v63 = vmul.f32 %v1326_v6, %v46_v57  ;;  %v162_v35 = vmax.f32 %v130_v30, 0.0  ;;  %v1135_v6 = vld [vmem:[%s1706_s5 + $0x30] sm:$0xff]  }
  0x25   :  { %v180_v36 = vpack.c.bf16 %v160_v33, %v159_v31  ;;  %1085 = vmatprep.subr.bf16.mxu1 %v1135_v6 }
  0x26   :  { %v124_v7 = vadd.f32 %v1333_v9, %v85_v63  ;;  %1086 = vmatpush3.bf16.msra.mxu1 %v1135_v6  ;;  %v1136_v9 = vld [vmem:[%s1706_s5 + $0x38] sm:$0xff]  }
  0x27   :  { %1087 = vmatprep.subr.bf16.mxu1 %v1136_v9 }
  0x28   :  { %v156_v17 = vmax.f32 %v124_v7, 0.0 }
  0x2a   :  { %1046 = vmatmul.mubr.bf16.gmra.mrb[4].mxu0 %v172_v27  ;;  %v178_v24 = vpack.c.bf16 %v156_v17, %v155_v16  ;;  %v179_v27 = vpack.c.bf16 %v158_v21, %v157_v20  ;;  %1088 = vmatpush3.bf16.msra.mxu1 %v1136_v9 }
  0x2b   :  { %1049 = vmatprep.mubr.bf16.mxu0 %v173_v34  ;;  %v161_v34 = vmax.f32 %v129_v29, 0.0 }
  0x2d   :  { %v181_v37 = vpack.c.bf16 %v162_v35, %v161_v34 }
  0x32   :  { %1050 = vmatmul.mubr.bf16.gmra.mrb[8].mxu0 %v174_v50 }
  0x33   :  { %1053 = vmatprep.mubr.bf16.mxu0 %v175_v53 }
  0x3a   :  { %1054 = vmatmul.mubr.bf16.gmra.mrb[12].mxu0 %v176_v4 }
  0x3b   :  { %1057 = vmatprep.mubr.bf16.mxu0 %v177_v8 }
  0x42   :  { %1058 = vmatmul.mubr.bf16.gmra.mrb[16].mxu0 %v178_v24 }
  0x43   :  { %1061 = vmatprep.mubr.bf16.mxu0 %v179_v27 }
  0x4a   :  { %1062 = vmatmul.mubr.bf16.gmra.mrb[20].mxu0 %v180_v36 }
  0x4b   :  { %1065 = vmatprep.mubr.bf16.mxu0 %v181_v37 }
  0x52   :  { %1066 = vmatmul.mubr.bf16.gmra.mrb[24].mxu0 %v1453_v28  ;;  %v1535_v28 = vld [vmem:[%s1707_s4] ss:$0 sm:$0xff] }
  0x53   :  { %1069 = vmatprep.mubr.bf16.mxu0 %v1457_v32 }
  0x5a   :  { %1070 = vmatmul.mubr.bf16.gmra.mrb[28].mxu0 %v1473_v41 }
  0xf5   :  { %v1043_v32 = vpop.f32.mrb[0].mxu0 }
  0xf6   :  { %v299_v38 = vadd.f32 %v1043_v32, %v1535_v28  ;;  %v290_v39 = vpop.f32.mrb[1].mxu0 }
  0xf7   :  { %v291_v40 = vadd.f32 %v1535_v28, %v290_v39  ;;  %v1044_v41 = vpop.f32.mrb[2].mxu0 }
  0xf8   :  { %v302_v42 = vadd.f32 %v1044_v41, %v1535_v28  ;;  %v293_v43 = vpop.f32.mrb[3].mxu0  ;;  %v419_v45 = vmax.f32 %v299_v38, 0.0 }
  0xf9   :  { %v294_v44 = vadd.f32 %v1535_v28, %v293_v43  ;;  %v417_v47 = vmax.f32 %v291_v40, 0.0 }
  0xfa   :  { %v420_v46 = vmax.f32 %v302_v42, 0.0 }
  0xfb   :  { %v418_v48 = vmax.f32 %v294_v44, 0.0 }
  0xfc   :  { %v450_v49 = vpack.c.bf16 %v420_v46, %v419_v45 }
  0xfd   :  { %v1047_v50 = vpop.f32.mrb[4].mxu0  ;;  %v449_v51 = vpack.c.bf16 %v418_v48, %v417_v47 }
  0xfe   :  { %v315_v52 = vadd.f32 %v1047_v50, %v1535_v28  ;;  %v306_v53 = vpop.f32.mrb[5].mxu0 }
  0xff   :  { %v307_v54 = vadd.f32 %v1535_v28, %v306_v53  ;;  %v1048_v55 = vpop.f32.mrb[6].mxu0  ;;  %1089 = vmatprep.mubr.bf16.mxu1 %v449_v51 }
 0x100   :  { %v318_v56 = vadd.f32 %v1048_v55, %v1535_v28  ;;  %v309_v57 = vpop.f32.mrb[7].mxu0  ;;  %1090 = vmatmul.mubr.bf16.vlgmr.msra.gmra.mrb[0].mxu1 %v450_v49  ;;  %v423_v59 = vmax.f32 %v315_v52, 0.0 }
 0x101   :  { %v310_v58 = vadd.f32 %v1535_v28, %v309_v57  ;;  %v421_v61 = vmax.f32 %v307_v54, 0.0 }
 0x102   :  { %v424_v60 = vmax.f32 %v318_v56, 0.0 }
 0x103   :  { %v422_v62 = vmax.f32 %v310_v58, 0.0 }
 0x104   :  { %v452_v63 = vpack.c.bf16 %v424_v60, %v423_v59 }
 0x105   :  { %v451_v0 = vpack.c.bf16 %v422_v62, %v421_v61  ;;  %v1051_v1 = vpop.f32.mrb[8].mxu0 }
 0x106   :  { %v331_v2 = vadd.f32 %v1051_v1, %v1535_v28  ;;  %v322_v3 = vpop.f32.mrb[9].mxu0 }
 0x107   :  { %v323_v4 = vadd.f32 %v1535_v28, %v322_v3  ;;  %v1052_v5 = vpop.f32.mrb[10].mxu0  ;;  %1093 = vmatprep.mubr.bf16.mxu1 %v451_v0 }
 0x108   :  { %v334_v7 = vadd.f32 %v1052_v5, %v1535_v28  ;;  %v325_v8 = vpop.f32.mrb[11].mxu0  ;;  %1094 = vmatmul.mubr.bf16.gmra.mrb[4].mxu1 %v452_v63  ;;  %v427_v11 = vmax.f32 %v331_v2, 0.0 }
 0x109   :  { %v326_v10 = vadd.f32 %v1535_v28, %v325_v8  ;;  %v425_v13 = vmax.f32 %v323_v4, 0.0 }
 0x10a   :  { %v428_v12 = vmax.f32 %v334_v7, 0.0 }
 0x10b   :  { %v426_v14 = vmax.f32 %v326_v10, 0.0 }
 0x10c   :  { %v454_v15 = vpack.c.bf16 %v428_v12, %v427_v11 }
 0x10d   :  { %v453_v16 = vpack.c.bf16 %v426_v14, %v425_v13  ;;  %v1055_v17 = vpop.f32.mrb[12].mxu0 }
 0x10e   :  { %v347_v18 = vadd.f32 %v1055_v17, %v1535_v28  ;;  %v338_v19 = vpop.f32.mrb[13].mxu0 }
 0x10f   :  { %v339_v20 = vadd.f32 %v1535_v28, %v338_v19  ;;  %v1056_v21 = vpop.f32.mrb[14].mxu0  ;;  %1097 = vmatprep.mubr.bf16.mxu1 %v453_v16 }
 0x110   :  { %v350_v22 = vadd.f32 %v1056_v21, %v1535_v28  ;;  %v341_v23 = vpop.f32.mrb[15].mxu0  ;;  %1098 = vmatmul.mubr.bf16.gmra.mrb[8].mxu1 %v454_v15  ;;  %v431_v25 = vmax.f32 %v347_v18, 0.0 }
 0x111   :  { %v342_v24 = vadd.f32 %v1535_v28, %v341_v23  ;;  %v429_v27 = vmax.f32 %v339_v20, 0.0 }
 0x112   :  { %v432_v26 = vmax.f32 %v350_v22, 0.0 }
 0x113   :  { %v430_v29 = vmax.f32 %v342_v24, 0.0  ;;  %v1572_v24 = vld [vmem:[%s1708_s6] ss:$0 sm:$0xff] }
 0x114   :  { %v456_v30 = vpack.c.bf16 %v432_v26, %v431_v25 }
 0x115   :  { %v455_v31 = vpack.c.bf16 %v430_v29, %v429_v27  ;;  %v1059_v33 = vpop.f32.mrb[16].mxu0 }
 0x116   :  { %v363_v34 = vadd.f32 %v1059_v33, %v1535_v28  ;;  %v354_v35 = vpop.f32.mrb[17].mxu0 }
 0x117   :  { %v355_v36 = vadd.f32 %v1535_v28, %v354_v35  ;;  %v1060_v37 = vpop.f32.mrb[18].mxu0  ;;  %1101 = vmatprep.mubr.bf16.mxu1 %v455_v31 }
 0x118   :  { %v366_v6 = vadd.f32 %v1060_v37, %v1535_v28  ;;  %v357_v9 = vpop.f32.mrb[19].mxu0  ;;  %1102 = vmatmul.mubr.bf16.gmra.mrb[12].mxu1 %v456_v30  ;;  %v435_v38 = vmax.f32 %v363_v34, 0.0 }
 0x119   :  { %v358_v32 = vadd.f32 %v1535_v28, %v357_v9  ;;  %v433_v40 = vmax.f32 %v355_v36, 0.0 }
 0x11a   :  { %v436_v39 = vmax.f32 %v366_v6, 0.0 }
 0x11b   :  { %v434_v41 = vmax.f32 %v358_v32, 0.0 }
 0x11c   :  { %v458_v42 = vpack.c.bf16 %v436_v39, %v435_v38 }
 0x11d   :  { %v457_v43 = vpack.c.bf16 %v434_v41, %v433_v40  ;;  %v1063_v44 = vpop.f32.mrb[20].mxu0 }
 0x11e   :  { %v379_v45 = vadd.f32 %v1063_v44, %v1535_v28  ;;  %v370_v46 = vpop.f32.mrb[21].mxu0 }
 0x11f   :  { %v371_v47 = vadd.f32 %v1535_v28, %v370_v46  ;;  %v1064_v48 = vpop.f32.mrb[22].mxu0  ;;  %1105 = vmatprep.mubr.bf16.mxu1 %v457_v43 }
 0x120   :  { %v382_v49 = vadd.f32 %v1064_v48, %v1535_v28  ;;  %v373_v50 = vpop.f32.mrb[23].mxu0  ;;  %1106 = vmatmul.mubr.bf16.gmra.mrb[16].mxu1 %v458_v42  ;;  %v439_v52 = vmax.f32 %v379_v45, 0.0 }
 0x121   :  { %v374_v51 = vadd.f32 %v1535_v28, %v373_v50  ;;  %v437_v54 = vmax.f32 %v371_v47, 0.0 }
 0x122   :  { %v440_v53 = vmax.f32 %v382_v49, 0.0 }
 0x123   :  { %v438_v55 = vmax.f32 %v374_v51, 0.0 }
 0x124   :  { %v460_v56 = vpack.c.bf16 %v440_v53, %v439_v52 }
 0x125   :  { %v459_v57 = vpack.c.bf16 %v438_v55, %v437_v54  ;;  %v1067_v58 = vpop.f32.mrb[24].mxu0 }
 0x126   :  { %v395_v59 = vadd.f32 %v1067_v58, %v1535_v28  ;;  %v386_v60 = vpop.f32.mrb[25].mxu0 }
 0x127   :  { %v387_v61 = vadd.f32 %v1535_v28, %v386_v60  ;;  %v1068_v62 = vpop.f32.mrb[26].mxu0  ;;  %1109 = vmatprep.mubr.bf16.mxu1 %v459_v57 }
 0x128   :  { %v398_v63 = vadd.f32 %v1068_v62, %v1535_v28  ;;  %v389_v0 = vpop.f32.mrb[27].mxu0  ;;  %1110 = vmatmul.mubr.bf16.gmra.mrb[20].mxu1 %v460_v56  ;;  %v443_v2 = vmax.f32 %v395_v59, 0.0 }
 0x129   :  { %v390_v1 = vadd.f32 %v1535_v28, %v389_v0  ;;  %v441_v4 = vmax.f32 %v387_v61, 0.0 }
 0x12a   :  { %v444_v3 = vmax.f32 %v398_v63, 0.0 }
 0x12b   :  { %v442_v5 = vmax.f32 %v390_v1, 0.0 }
 0x12c   :  { %v462_v7 = vpack.c.bf16 %v444_v3, %v443_v2 }
 0x12d   :  { %v461_v8 = vpack.c.bf16 %v442_v5, %v441_v4  ;;  %v1071_v10 = vpop.f32.mrb[28].mxu0 }
 0x12e   :  { %v411_v11 = vadd.f32 %v1071_v10, %v1535_v28  ;;  %v402_v12 = vpop.f32.mrb[29].mxu0 }
 0x12f   :  { %v403_v13 = vadd.f32 %v1535_v28, %v402_v12  ;;  %v1072_v14 = vpop.f32.mrb[30].mxu0  ;;  %1113 = vmatprep.mubr.bf16.mxu1 %v461_v8 }
 0x130   :  { %v414_v15 = vadd.f32 %v1072_v14, %v1535_v28  ;;  %v405_v16 = vpop.f32.mrb[31].mxu0  ;;  %1114 = vmatmul.mubr.bf16.gmra.mrb[24].mxu1 %v462_v7  ;;  %v447_v18 = vmax.f32 %v411_v11, 0.0 }
 0x131   :  { %v406_v17 = vadd.f32 %v1535_v28, %v405_v16  ;;  %v445_v20 = vmax.f32 %v403_v13, 0.0 }
 0x132   :  { %v448_v19 = vmax.f32 %v414_v15, 0.0 }
 0x133   :  { %v446_v21 = vmax.f32 %v406_v17, 0.0 }
 0x134   :  { %v464_v22 = vpack.c.bf16 %v448_v19, %v447_v18 }
 0x135   :  { %v463_v23 = vpack.c.bf16 %v446_v21, %v445_v20 }
 0x137   :  { %1117 = vmatprep.mubr.bf16.mxu1 %v463_v23 }
 0x138   :  { %1118 = vmatmul.mubr.bf16.gmra.mrb[28].mxu1 %v464_v22 }
 0x1d3   :  { %v1091_v25 = vpop.f32.mrb[0].mxu1 }
 0x1d4   :  { %v579_v26 = vadd.f32 %v1091_v25, %v1572_v24  ;;  %v570_v27 = vpop.f32.mrb[1].mxu1 }
 0x1d5   :  { %v571_v29 = vadd.f32 %v1572_v24, %v570_v27  ;;  %v1092_v28 = vpop.f32.mrb[2].mxu1 }
 0x1d6   :  { %v947_v30 = vmul.f32 -1.442695, %v579_v26  ;;  %v582_v31 = vadd.f32 %v1092_v28, %v1572_v24  ;;  %v573_v33 = vpop.f32.mrb[3].mxu1 }
 0x1d7   :  { %v945_v34 = vmul.f32 -1.442695, %v571_v29  ;;  %v574_v35 = vadd.f32 %v1572_v24, %v573_v33 }
 0x1d8   :  { %1137 = vpow2.f32 %v947_v30  ;;  %v948_v36 = vmul.f32 -1.442695, %v582_v31 }
 0x1d9   :  { %1139 = vpow2.f32 %v945_v34  ;;  %v946_v37 = vmul.f32 -1.442695, %v574_v35 }
 0x1da   :  { %1141 = vpow2.f32 %v948_v36 }
 0x1db   :  { %1143 = vpow2.f32 %v946_v37  ;;  %v1095_v6 = vpop.f32.mrb[4].mxu1 }
 0x1dc   :  { %v595_v9 = vadd.f32 %v1095_v6, %v1572_v24  ;;  %v586_v32 = vpop.f32.mrb[5].mxu1 }
 0x1dd   :  { %v587_v38 = vadd.f32 %v1572_v24, %v586_v32  ;;  %v1096_v39 = vpop.f32.mrb[6].mxu1 }
 0x1de   :  { %v951_v40 = vmul.f32 -1.442695, %v595_v9  ;;  %v598_v41 = vadd.f32 %v1096_v39, %v1572_v24  ;;  %v589_v42 = vpop.f32.mrb[7].mxu1 }
 0x1df   :  { %v949_v43 = vmul.f32 -1.442695, %v587_v38  ;;  %v590_v44 = vadd.f32 %v1572_v24, %v589_v42 }
 0x1e0   :  { %1145 = vpow2.f32 %v951_v40  ;;  %v952_v45 = vmul.f32 -1.442695, %v598_v41 }
 0x1e1   :  { %1147 = vpow2.f32 %v949_v43  ;;  %v950_v46 = vmul.f32 -1.442695, %v590_v44 }
 0x1e2   :  { %v1138_v47 = vpop.eup %1137  ;;  %1149 = vpow2.f32 %v952_v45 }
 0x1e3   :  { %v1140_v48 = vpop.eup %1139  ;;  %v795_v49 = vadd.f32 1.0, %v1138_v47  ;;  %1151 = vpow2.f32 %v950_v46  ;;  %v1099_v50 = vpop.f32.mrb[8].mxu1 }
 0x1e4   :  { %v1142_v51 = vpop.eup %1141  ;;  %v793_v52 = vadd.f32 1.0, %v1140_v48  ;;  %v611_v53 = vadd.f32 %v1099_v50, %v1572_v24  ;;  %v602_v54 = vpop.f32.mrb[9].mxu1 }
 0x1e5   :  { %v1144_v55 = vpop.eup %1143  ;;  %1153 = vrcp.f32 %v795_v49  ;;  %v796_v56 = vadd.f32 1.0, %v1142_v51  ;;  %v603_v57 = vadd.f32 %v1572_v24, %v602_v54  ;;  %v1100_v58 = vpop.f32.mrb[10].mxu1 }
 0x1e6   :  { %1155 = vrcp.f32 %v793_v52  ;;  %v794_v59 = vadd.f32 1.0, %v1144_v55  ;;  %v955_v60 = vmul.f32 -1.442695, %v611_v53  ;;  %v614_v61 = vadd.f32 %v1100_v58, %v1572_v24  ;;  %v605_v62 = vpop.f32.mrb[11].mxu1 }
 0x1e7   :  { %1157 = vrcp.f32 %v796_v56  ;;  %v953_v63 = vmul.f32 -1.442695, %v603_v57  ;;  %v606_v0 = vadd.f32 %v1572_v24, %v605_v62 }
 0x1e8   :  { %1159 = vrcp.f32 %v794_v59  ;;  %v956_v1 = vmul.f32 -1.442695, %v614_v61 }
 0x1e9   :  { %1161 = vpow2.f32 %v955_v60  ;;  %v954_v2 = vmul.f32 -1.442695, %v606_v0 }
 0x1ea   :  { %v1146_v3 = vpop.eup %1145  ;;  %1163 = vpow2.f32 %v953_v63 }
 0x1eb   :  { %v1148_v4 = vpop.eup %1147  ;;  %v799_v5 = vadd.f32 1.0, %v1146_v3  ;;  %1165 = vpow2.f32 %v956_v1  ;;  %v1103_v7 = vpop.f32.mrb[12].mxu1 }
 0x1ec   :  { %v1150_v8 = vpop.eup %1149  ;;  %v797_v10 = vadd.f32 1.0, %v1148_v4  ;;  %1167 = vpow2.f32 %v954_v2  ;;  %v627_v11 = vadd.f32 %v1103_v7, %v1572_v24  ;;  %v618_v12 = vpop.f32.mrb[13].mxu1 }
 0x1ed   :  { %v1152_v13 = vpop.eup %1151  ;;  %1169 = vrcp.f32 %v799_v5  ;;  %v800_v14 = vadd.f32 1.0, %v1150_v8  ;;  %v619_v15 = vadd.f32 %v1572_v24, %v618_v12  ;;  %v1104_v16 = vpop.f32.mrb[14].mxu1 }
 0x1ee   :  { %1171 = vrcp.f32 %v797_v10  ;;  %v798_v17 = vadd.f32 1.0, %v1152_v13  ;;  %v959_v18 = vmul.f32 -1.442695, %v627_v11  ;;  %v630_v19 = vadd.f32 %v1104_v16, %v1572_v24  ;;  %v621_v20 = vpop.f32.mrb[15].mxu1 }
 0x1ef   :  { %v1154_v21 = vpop.eup %1153  ;;  %1173 = vrcp.f32 %v800_v14  ;;  %v957_v22 = vmul.f32 -1.442695, %v619_v15  ;;  %v622_v23 = vadd.f32 %v1572_v24, %v621_v20 }
 0x1f0   :  { %v1156_v25 = vpop.eup %1155  ;;  %891 = vst [vmem:[%s1709_s7 + $0x10] sm:$0xff] %v1154_v21  ;;  %1175 = vrcp.f32 %v798_v17  ;;  %v960_v26 = vmul.f32 -1.442695, %v630_v19 }
 0x1f1   :  { %v1158_v27 = vpop.eup %1157  ;;  %889 = vst [vmem:[%s1709_s7] sm:$0xff] %v1156_v25  ;;  %1177 = vpow2.f32 %v959_v18  ;;  %v958_v29 = vmul.f32 -1.442695, %v622_v23 }
 0x1f2   :  { %v1160_v28 = vpop.eup %1159  ;;  %892 = vst [vmem:[%s1709_s7 + $0x18] sm:$0xff] %v1158_v27  ;;  %1179 = vpow2.f32 %v957_v22 }
 0x1f3   :  { %v1162_v30 = vpop.eup %1161  ;;  %890 = vst [vmem:[%s1709_s7 + $0x8] sm:$0xff] %v1160_v28  ;;  %1181 = vpow2.f32 %v960_v26  ;;  %v1107_v31 = vpop.f32.mrb[16].mxu1 }
 0x1f4   :  { %v1164_v33 = vpop.eup %1163  ;;  %v803_v34 = vadd.f32 1.0, %v1162_v30  ;;  %1183 = vpow2.f32 %v958_v29  ;;  %v643_v35 = vadd.f32 %v1107_v31, %v1572_v24  ;;  %v634_v36 = vpop.f32.mrb[17].mxu1 }
 0x1f5   :  { %v1166_v37 = vpop.eup %1165  ;;  %v801_v6 = vadd.f32 1.0, %v1164_v33  ;;  %v635_v9 = vadd.f32 %v1572_v24, %v634_v36  ;;  %v1108_v32 = vpop.f32.mrb[18].mxu1 }
 0x1f6   :  { %v1168_v38 = vpop.eup %1167  ;;  %1185 = vrcp.f32 %v803_v34  ;;  %v804_v39 = vadd.f32 1.0, %v1166_v37  ;;  %v963_v40 = vmul.f32 -1.442695, %v643_v35  ;;  %v646_v41 = vadd.f32 %v1108_v32, %v1572_v24  ;;  %v637_v42 = vpop.f32.mrb[19].mxu1 }
 0x1f7   :  { %v1170_v43 = vpop.eup %1169  ;;  %1187 = vrcp.f32 %v801_v6  ;;  %v802_v44 = vadd.f32 1.0, %v1168_v38  ;;  %v961_v45 = vmul.f32 -1.442695, %v635_v9  ;;  %v638_v46 = vadd.f32 %v1572_v24, %v637_v42 }
 0x1f8   :  { %v1172_v47 = vpop.eup %1171  ;;  %895 = vst [vmem:[%s1709_s7 + $0x30] sm:$0xff] %v1170_v43  ;;  %1189 = vrcp.f32 %v804_v39  ;;  %v964_v48 = vmul.f32 -1.442695, %v646_v41 }
 0x1f9   :  { %v1174_v49 = vpop.eup %1173  ;;  %893 = vst [vmem:[%s1709_s7 + $0x20] sm:$0xff] %v1172_v47  ;;  %1191 = vrcp.f32 %v802_v44  ;;  %v962_v50 = vmul.f32 -1.442695, %v638_v46 }
 0x1fa   :  { %v1176_v51 = vpop.eup %1175  ;;  %896 = vst [vmem:[%s1709_s7 + $0x38] sm:$0xff] %v1174_v49  ;;  %1193 = vpow2.f32 %v963_v40 }
 0x1fb   :  { %v1178_v52 = vpop.eup %1177  ;;  %894 = vst [vmem:[%s1709_s7 + $0x28] sm:$0xff] %v1176_v51  ;;  %1195 = vpow2.f32 %v961_v45  ;;  %v1111_v53 = vpop.f32.mrb[20].mxu1 }
 0x1fc   :  { %v1180_v54 = vpop.eup %1179  ;;  %v807_v55 = vadd.f32 1.0, %v1178_v52  ;;  %1197 = vpow2.f32 %v964_v48  ;;  %v659_v56 = vadd.f32 %v1111_v53, %v1572_v24  ;;  %v650_v57 = vpop.f32.mrb[21].mxu1 }
 0x1fd   :  { %v1182_v58 = vpop.eup %1181  ;;  %v805_v59 = vadd.f32 1.0, %v1180_v54  ;;  %1199 = vpow2.f32 %v962_v50  ;;  %v651_v60 = vadd.f32 %v1572_v24, %v650_v57  ;;  %v1112_v61 = vpop.f32.mrb[22].mxu1 }
 0x1fe   :  { %v1184_v62 = vpop.eup %1183  ;;  %1201 = vrcp.f32 %v807_v55  ;;  %v808_v63 = vadd.f32 1.0, %v1182_v58  ;;  %v967_v0 = vmul.f32 -1.442695, %v659_v56  ;;  %v662_v1 = vadd.f32 %v1112_v61, %v1572_v24  ;;  %v653_v2 = vpop.f32.mrb[23].mxu1 }
 0x1ff   :  { %1203 = vrcp.f32 %v805_v59  ;;  %v806_v3 = vadd.f32 1.0, %v1184_v62  ;;  %v965_v4 = vmul.f32 -1.442695, %v651_v60  ;;  %v654_v5 = vadd.f32 %v1572_v24, %v653_v2 }
 0x200   :  { %v1186_v7 = vpop.eup %1185  ;;  %1205 = vrcp.f32 %v808_v63  ;;  %v968_v8 = vmul.f32 -1.442695, %v662_v1 }
 0x201   :  { %v1188_v10 = vpop.eup %1187  ;;  %899 = vst [vmem:[%s1709_s7 + $0x50] sm:$0xff] %v1186_v7  ;;  %1207 = vrcp.f32 %v806_v3  ;;  %v966_v11 = vmul.f32 -1.442695, %v654_v5 }
 0x202   :  { %v1190_v12 = vpop.eup %1189  ;;  %897 = vst [vmem:[%s1709_s7 + $0x40] sm:$0xff] %v1188_v10  ;;  %1209 = vpow2.f32 %v967_v0 }
 0x203   :  { %v1192_v13 = vpop.eup %1191  ;;  %900 = vst [vmem:[%s1709_s7 + $0x58] sm:$0xff] %v1190_v12  ;;  %1211 = vpow2.f32 %v965_v4  ;;  %v1115_v14 = vpop.f32.mrb[24].mxu1 }
 0x204   :  { %v1194_v15 = vpop.eup %1193  ;;  %898 = vst [vmem:[%s1709_s7 + $0x48] sm:$0xff] %v1192_v13  ;;  %1213 = vpow2.f32 %v968_v8  ;;  %v675_v16 = vadd.f32 %v1115_v14, %v1572_v24  ;;  %v666_v17 = vpop.f32.mrb[25].mxu1 }
 0x205   :  { %v1196_v18 = vpop.eup %1195  ;;  %v811_v19 = vadd.f32 1.0, %v1194_v15  ;;  %1215 = vpow2.f32 %v966_v11  ;;  %v667_v20 = vadd.f32 %v1572_v24, %v666_v17  ;;  %v1116_v21 = vpop.f32.mrb[26].mxu1 }
 0x206   :  { %v1198_v22 = vpop.eup %1197  ;;  %v809_v23 = vadd.f32 1.0, %v1196_v18  ;;  %v678_v25 = vadd.f32 %v1116_v21, %v1572_v24  ;;  %v669_v26 = vpop.f32.mrb[27].mxu1  ;;  %v971_v28 = vmul.f32 -1.442695, %v675_v16 }
 0x207   :  { %v1200_v27 = vpop.eup %1199  ;;  %1217 = vrcp.f32 %v811_v19  ;;  %v812_v29 = vadd.f32 1.0, %v1198_v22  ;;  %v670_v30 = vadd.f32 %v1572_v24, %v669_v26  ;;  %v969_v34 = vmul.f32 -1.442695, %v667_v20 }
 0x208   :  { %v1202_v31 = vpop.eup %1201  ;;  %1219 = vrcp.f32 %v809_v23  ;;  %v810_v33 = vadd.f32 1.0, %v1200_v27  ;;  %v972_v36 = vmul.f32 -1.442695, %v678_v25 }
 0x209   :  { %v1204_v35 = vpop.eup %1203  ;;  %903 = vst [vmem:[%s1709_s7 + $0x70] sm:$0xff] %v1202_v31  ;;  %1221 = vrcp.f32 %v812_v29  ;;  %v970_v6 = vmul.f32 -1.442695, %v670_v30 }
 0x20a   :  { %v1206_v37 = vpop.eup %1205  ;;  %901 = vst [vmem:[%s1709_s7 + $0x60] sm:$0xff] %v1204_v35  ;;  %1223 = vrcp.f32 %v810_v33 }
 0x20b   :  { %v1208_v9 = vpop.eup %1207  ;;  %904 = vst [vmem:[%s1709_s7 + $0x78] sm:$0xff] %v1206_v37  ;;  %1225 = vpow2.f32 %v971_v28  ;;  %v1119_v32 = vpop.f32.mrb[28].mxu1 }
 0x20c   :  { %v1210_v38 = vpop.eup %1209  ;;  %902 = vst [vmem:[%s1709_s7 + $0x68] sm:$0xff] %v1208_v9  ;;  %1227 = vpow2.f32 %v969_v34  ;;  %v691_v39 = vadd.f32 %v1119_v32, %v1572_v24  ;;  %v682_v40 = vpop.f32.mrb[29].mxu1 }
 0x20d   :  { %v1212_v41 = vpop.eup %1211  ;;  %v815_v42 = vadd.f32 1.0, %v1210_v38  ;;  %1229 = vpow2.f32 %v972_v36  ;;  %v683_v43 = vadd.f32 %v1572_v24, %v682_v40  ;;  %v1120_v44 = vpop.f32.mrb[30].mxu1 }
 0x20e   :  { %v1214_v45 = vpop.eup %1213  ;;  %v813_v46 = vadd.f32 1.0, %v1212_v41  ;;  %1231 = vpow2.f32 %v970_v6  ;;  %v694_v47 = vadd.f32 %v1120_v44, %v1572_v24  ;;  %v685_v48 = vpop.f32.mrb[31].mxu1  ;;  %v975_v51 = vmul.f32 -1.442695, %v691_v39 }
 0x20f   :  { %v1216_v49 = vpop.eup %1215  ;;  %1233 = vrcp.f32 %v815_v42  ;;  %v816_v50 = vadd.f32 1.0, %v1214_v45  ;;  %v686_v52 = vadd.f32 %v1572_v24, %v685_v48  ;;  %v973_v54 = vmul.f32 -1.442695, %v683_v43 }
 0x210   :  { %1235 = vrcp.f32 %v813_v46  ;;  %v814_v53 = vadd.f32 1.0, %v1216_v49  ;;  %v976_v56 = vmul.f32 -1.442695, %v694_v47 }
 0x211   :  { %v1218_v55 = vpop.eup %1217  ;;  %1237 = vrcp.f32 %v816_v50  ;;  %v974_v58 = vmul.f32 -1.442695, %v686_v52 }
 0x212   :  { %v1220_v57 = vpop.eup %1219  ;;  %907 = vst [vmem:[%s1709_s7 + $0x90] sm:$0xff] %v1218_v55  ;;  %1239 = vrcp.f32 %v814_v53 }
 0x213   :  { %v1222_v59 = vpop.eup %1221  ;;  %905 = vst [vmem:[%s1709_s7 + $0x80] sm:$0xff] %v1220_v57  ;;  %1241 = vpow2.f32 %v975_v51 }
 0x214   :  { %v1224_v24 = vpop.eup %1223  ;;  %908 = vst [vmem:[%s1709_s7 + $0x98] sm:$0xff] %v1222_v59  ;;  %1243 = vpow2.f32 %v973_v54 }
 0x215   :  { %v1226_v60 = vpop.eup %1225  ;;  %906 = vst [vmem:[%s1709_s7 + $0x88] sm:$0xff] %v1224_v24  ;;  %1245 = vpow2.f32 %v976_v56 }
 0x216   :  { %v1228_v61 = vpop.eup %1227  ;;  %v819_v62 = vadd.f32 1.0, %v1226_v60  ;;  %1247 = vpow2.f32 %v974_v58 }
 0x217   :  { %v1230_v63 = vpop.eup %1229  ;;  %v817_v0 = vadd.f32 1.0, %v1228_v61 }
 0x218   :  { %v1232_v1 = vpop.eup %1231  ;;  %1249 = vrcp.f32 %v819_v62  ;;  %v820_v2 = vadd.f32 1.0, %v1230_v63 }
 0x219   :  { %v1234_v3 = vpop.eup %1233  ;;  %1251 = vrcp.f32 %v817_v0  ;;  %v818_v4 = vadd.f32 1.0, %v1232_v1 }
 0x21a   :  { %v1236_v5 = vpop.eup %1235  ;;  %911 = vst [vmem:[%s1709_s7 + $0xb0] sm:$0xff] %v1234_v3  ;;  %1253 = vrcp.f32 %v820_v2 }
 0x21b   :  { %v1238_v7 = vpop.eup %1237  ;;  %909 = vst [vmem:[%s1709_s7 + $0xa0] sm:$0xff] %v1236_v5  ;;  %1255 = vrcp.f32 %v818_v4 }
 0x21c   :  { %v1240_v8 = vpop.eup %1239  ;;  %912 = vst [vmem:[%s1709_s7 + $0xb8] sm:$0xff] %v1238_v7 }
 0x21d   :  { %v1242_v10 = vpop.eup %1241  ;;  %910 = vst [vmem:[%s1709_s7 + $0xa8] sm:$0xff] %v1240_v8 }
 0x21e   :  { %v1244_v11 = vpop.eup %1243  ;;  %v823_v12 = vadd.f32 1.0, %v1242_v10 }
 0x21f   :  { %v1246_v13 = vpop.eup %1245  ;;  %v821_v14 = vadd.f32 1.0, %v1244_v11 }
 0x220   :  { %v1248_v15 = vpop.eup %1247  ;;  %1257 = vrcp.f32 %v823_v12  ;;  %v824_v16 = vadd.f32 1.0, %v1246_v13 }
 0x221   :  { %1259 = vrcp.f32 %v821_v14  ;;  %v822_v17 = vadd.f32 1.0, %v1248_v15 }
 0x222   :  { %v1250_v18 = vpop.eup %1249  ;;  %1261 = vrcp.f32 %v824_v16 }
 0x223   :  { %v1252_v19 = vpop.eup %1251  ;;  %915 = vst [vmem:[%s1709_s7 + $0xd0] sm:$0xff] %v1250_v18  ;;  %1263 = vrcp.f32 %v822_v17 }
 0x224   :  { %v1254_v20 = vpop.eup %1253  ;;  %913 = vst [vmem:[%s1709_s7 + $0xc0] sm:$0xff] %v1252_v19 }
 0x225   :  { %v1256_v21 = vpop.eup %1255  ;;  %916 = vst [vmem:[%s1709_s7 + $0xd8] sm:$0xff] %v1254_v20 }
 0x226   :  { %914 = vst [vmem:[%s1709_s7 + $0xc8] sm:$0xff] %v1256_v21 }
 0x22a   :  { %v1258_v22 = vpop.eup %1257 }
 0x22b   :  { %v1260_v23 = vpop.eup %1259  ;;  %919 = vst [vmem:[%s1709_s7 + $0xf0] sm:$0xff] %v1258_v22 }
 0x22c   :  { %v1262_v25 = vpop.eup %1261  ;;  %917 = vst [vmem:[%s1709_s7 + $0xe0] sm:$0xff] %v1260_v23 }
 0x22d   :  { %v1264_v26 = vpop.eup %1263  ;;  %920 = vst [vmem:[%s1709_s7 + $0xf8] sm:$0xff] %v1262_v25 }
 0x22e   :  { %918 = vst [vmem:[%s1709_s7 + $0xe8] sm:$0xff] %v1264_v26 }

// kernel: _lambda_.5
= control target key start
LH: loop header
LB: loop body
LE: loop exit
PB: predicated region body
PF: predicated region fallthrough
CT: control target
= control target key end

     0   :  { %s2082_s4 = inlined_call_operand.vmem [shape: bf16[128,128], index: 4, kind: input, shape index: {}]   ;;  %s2083_s1 = inlined_call_operand.vmem [shape: f32[256,128], index: 1, kind: input, shape index: {}]   ;;  %s2084_s2 = inlined_call_operand.vmem [shape: f32[1,128], index: 2, kind: input, shape index: {}]   ;;  %s2085_s3 = inlined_call_operand.vmem [shape: f32[1,128], index: 3, kind: input, shape index: {}]   ;;  %s2086_s0 = inlined_call_operand.vmem [shape: bf16[256,256], index: 0, kind: input, shape index: {}]   ;;  %s2087_s6 = inlined_call_operand.vmem [shape: f32[256,128], index: 6, kind: output, shape index: {0}]   ;;  %s2088_s5 = inlined_call_operand.vmem [shape: f32[1,128], index: 5, kind: input, shape index: {}]   ;;  %s2089_s7 = inlined_call_operand.vmem [shape: f32[1,1,128], index: 7, kind: output, shape index: {1}]   ;;  %s2090_s8 = inlined_call_operand.vmem [shape: f32[1,1,128], index: 8, kind: output, shape index: {2}]  }
   0x1   :  { %v1576_v0 = vld [vmem:[%s2082_s4] sm:$0xff]   ;;  %v1577_v1 = vld [vmem:[%s2082_s4 + $0x8] sm:$0xff]   ;;  %v1578_v2 = vld [vmem:[%s2082_s4 + $0x10] sm:$0xff]  }
   0x2   :  { %1511 = vmatprep.subr.bf16.mxu0 %v1576_v0  ;;  %v1579_v3 = vld [vmem:[%s2082_s4 + $0x18] sm:$0xff]   ;;  %v27_v4 = vld [vmem:[%s2083_s1] sm:$0xff]  ;;  %v28_v5 = vld [vmem:[%s2083_s1 + $0x8] sm:$0xff] }
   0x3   :  { %1512 = vmatpush3.bf16.msra.mxu0 %v1576_v0  ;;  %v1699_v6 = vld [vmem:[%s2084_s2] ss:$0 sm:$0xff]  ;;  %v29_v15 = vld [vmem:[%s2083_s1 + $0x10] sm:$0xff]  ;;  %v30_v16 = vld [vmem:[%s2083_s1 + $0x18] sm:$0xff] }
   0x4   :  { %1513 = vmatprep.subr.bf16.mxu0 %v1577_v1  ;;  %v66_v7 = vmul.f32 %v1699_v6, %v27_v4  ;;  %v67_v8 = vmul.f32 %v1699_v6, %v28_v5  ;;  %v1706_v9 = vld [vmem:[%s2085_s3] ss:$0 sm:$0xff]  ;;  %v32_v19 = vld [vmem:[%s2083_s1 + $0x28] sm:$0xff]  ;;  %v68_v21 = vmul.f32 %v1699_v6, %v29_v15  ;;  %v69_v22 = vmul.f32 %v1699_v6, %v30_v16  ;;  %v33_v25 = vld [vmem:[%s2083_s1 + $0x30] sm:$0xff] }
   0x5   :  { %v1580_v12 = vld [vmem:[%s2082_s4 + $0x20] sm:$0xff]   ;;  %v1581_v20 = vld [vmem:[%s2082_s4 + $0x28] sm:$0xff]   ;;  %v71_v24 = vmul.f32 %v1699_v6, %v32_v19  ;;  %v34_v26 = vld [vmem:[%s2083_s1 + $0x38] sm:$0xff]  ;;  %v72_v30 = vmul.f32 %v1699_v6, %v33_v25 }
   0x6   :  { %v105_v10 = vadd.f32 %v1706_v9, %v66_v7  ;;  %v106_v11 = vadd.f32 %v1706_v9, %v67_v8  ;;  %v31_v18 = vld [vmem:[%s2083_s1 + $0x20] sm:$0xff]  ;;  %v1582_v27 = vld [vmem:[%s2082_s4 + $0x30] sm:$0xff]   ;;  %v107_v28 = vadd.f32 %v1706_v9, %v68_v21  ;;  %v108_v29 = vadd.f32 %v1706_v9, %v69_v22  ;;  %v1583_v35 = vld [vmem:[%s2082_s4 + $0x38] sm:$0xff]  }
   0x7   :  { %1514 = vmatpush3.bf16.msra.mxu0 %v1577_v1  ;;  %v70_v23 = vmul.f32 %v1699_v6, %v31_v18  ;;  %v110_v32 = vadd.f32 %v1706_v9, %v71_v24  ;;  %v73_v33 = vmul.f32 %v1699_v6, %v34_v26  ;;  %v35_v34 = vld [vmem:[%s2083_s1 + $0x40] sm:$0xff]  ;;  %v36_v36 = vld [vmem:[%s2083_s1 + $0x48] sm:$0xff]  ;;  %v111_v39 = vadd.f32 %v1706_v9, %v72_v30  ;;  %v37_v45 = vld [vmem:[%s2083_s1 + $0x50] sm:$0xff] }
   0x8   :  { %1515 = vmatprep.subr.bf16.mxu0 %v1578_v2  ;;  %v137_v13 = vmax.f32 %v105_v10, 0.0  ;;  %v138_v14 = vmax.f32 %v106_v11, 0.0  ;;  %v139_v37 = vmax.f32 %v107_v28, 0.0  ;;  %v140_v38 = vmax.f32 %v108_v29, 0.0  ;;  %v38_v46 = vld [vmem:[%s2083_s1 + $0x58] sm:$0xff]  ;;  %v53_v47 = vld [vmem:[%s2083_s1 + $0xd0] sm:$0xff] }
   0x9   :  { %v109_v31 = vadd.f32 %v1706_v9, %v70_v23  ;;  %v142_v41 = vmax.f32 %v110_v32, 0.0  ;;  %v112_v42 = vadd.f32 %v1706_v9, %v73_v33  ;;  %v74_v43 = vmul.f32 %v1699_v6, %v35_v34  ;;  %v54_v48 = vld [vmem:[%s2083_s1 + $0xd8] sm:$0xff]  ;;  %v39_v50 = vld [vmem:[%s2083_s1 + $0x60] sm:$0xff]  ;;  %v56_v52 = vld [vmem:[%s2083_s1 + $0xe8] sm:$0xff] }
   0xa   :  { %v169_v17 = vpack.c.bf16 %v138_v14, %v137_v13  ;;  %v75_v44 = vmul.f32 %v1699_v6, %v36_v36  ;;  %v170_v49 = vpack.c.bf16 %v140_v38, %v139_v37  ;;  %v55_v51 = vld [vmem:[%s2083_s1 + $0xe0] sm:$0xff]  ;;  %v143_v54 = vmax.f32 %v111_v39, 0.0  ;;  %v40_v57 = vld [vmem:[%s2083_s1 + $0x68] sm:$0xff]  ;;  %v57_v58 = vld [vmem:[%s2083_s1 + $0xf0] sm:$0xff] }
   0xb   :  { %1516 = vmatpush3.bf16.msra.mxu0 %v1578_v2  ;;  %v141_v40 = vmax.f32 %v109_v31, 0.0  ;;  %v144_v55 = vmax.f32 %v112_v42, 0.0  ;;  %v113_v56 = vadd.f32 %v1706_v9, %v74_v43  ;;  %v76_v60 = vmul.f32 %v1699_v6, %v37_v45  ;;  %v58_v63 = vld [vmem:[%s2083_s1 + $0xf8] sm:$0xff]  ;;  %v41_v31 = vld [vmem:[%s2083_s1 + $0x70] sm:$0xff]  ;;  %v43_v33 = vld [vmem:[%s2083_s1 + $0x80] sm:$0xff] }
   0xc   :  { %1517 = vmatprep.subr.bf16.mxu0 %v1579_v3  ;;  %1527 = vmatprep.mubr.bf16.mxu0 %v169_v17  ;;  %v114_v59 = vadd.f32 %v1706_v9, %v75_v44  ;;  %v92_v61 = vmul.f32 %v1699_v6, %v53_v47  ;;  %v93_v62 = vmul.f32 %v1699_v6, %v54_v48  ;;  %v42_v32 = vld [vmem:[%s2083_s1 + $0x78] sm:$0xff]  ;;  %v44_v34 = vld [vmem:[%s2083_s1 + $0x88] sm:$0xff] }
   0xd   :  { %v171_v53 = vpack.c.bf16 %v142_v41, %v141_v40  ;;  %v77_v0 = vmul.f32 %v1699_v6, %v38_v46  ;;  %v78_v1 = vmul.f32 %v1699_v6, %v39_v50  ;;  %v94_v2 = vmul.f32 %v1699_v6, %v55_v51  ;;  %v45_v50 = vld [vmem:[%s2083_s1 + $0x90] sm:$0xff]  ;;  %v46_v51 = vld [vmem:[%s2083_s1 + $0x98] sm:$0xff] }
   0xe   :  { %v79_v4 = vmul.f32 %v1699_v6, %v40_v57  ;;  %v131_v5 = vadd.f32 %v1706_v9, %v92_v61  ;;  %v132_v7 = vadd.f32 %v1706_v9, %v93_v62  ;;  %v96_v8 = vmul.f32 %v1699_v6, %v57_v58 }
   0xf   :  { %1518 = vmatpush3.bf16.msra.mxu0 %v1579_v3  ;;  %v95_v3 = vmul.f32 %v1699_v6, %v56_v52  ;;  %v145_v10 = vmax.f32 %v113_v56, 0.0  ;;  %v133_v11 = vadd.f32 %v1706_v9, %v94_v2  ;;  %v97_v13 = vmul.f32 %v1699_v6, %v58_v63  ;;  %v47_v52 = vld [vmem:[%s2083_s1 + $0xa0] sm:$0xff] }
  0x10   :  { %1519 = vmatprep.subr.bf16.mxu0 %v1580_v12  ;;  %v146_v14 = vmax.f32 %v114_v59, 0.0  ;;  %v163_v15 = vmax.f32 %v131_v5, 0.0  ;;  %v164_v16 = vmax.f32 %v132_v7, 0.0  ;;  %v135_v17 = vadd.f32 %v1706_v9, %v96_v8  ;;  %v50_v5 = vld [vmem:[%s2083_s1 + $0xb8] sm:$0xff]  ;;  %v51_v7 = vld [vmem:[%s2083_s1 + $0xc0] sm:$0xff]  ;;  %v52_v8 = vld [vmem:[%s2083_s1 + $0xc8] sm:$0xff] }
  0x11   :  { %v165_v18 = vmax.f32 %v133_v11, 0.0  ;;  %v172_v21 = vpack.c.bf16 %v144_v55, %v143_v54  ;;  %v115_v24 = vadd.f32 %v1706_v9, %v76_v60  ;;  %v116_v25 = vadd.f32 %v1706_v9, %v77_v0 }
  0x12   :  { %v1808_v22 = vpack.c.bf16 %v164_v16, %v163_v15  ;;  %v167_v23 = vmax.f32 %v135_v17, 0.0  ;;  %v173_v28 = vpack.c.bf16 %v146_v14, %v145_v10  ;;  %v117_v29 = vadd.f32 %v1706_v9, %v78_v1 }
  0x13   :  { %1520 = vmatpush3.bf16.msra.mxu0 %v1580_v12  ;;  %v134_v12 = vadd.f32 %v1706_v9, %v95_v3  ;;  %v118_v30 = vadd.f32 %v1706_v9, %v79_v4  ;;  %v147_v36 = vmax.f32 %v115_v24, 0.0  ;;  %v148_v37 = vmax.f32 %v116_v25, 0.0  ;;  %v49_v4 = vld [vmem:[%s2083_s1 + $0xb0] sm:$0xff] }
  0x14   :  { %1521 = vmatprep.subr.bf16.mxu0 %v1581_v20  ;;  %v80_v38 = vmul.f32 %v1699_v6, %v41_v31  ;;  %v81_v39 = vmul.f32 %v1699_v6, %v42_v32  ;;  %v149_v40 = vmax.f32 %v117_v29, 0.0  ;;  %v82_v42 = vmul.f32 %v1699_v6, %v43_v33 }
  0x15   :  { %v166_v19 = vmax.f32 %v134_v12, 0.0  ;;  %v150_v41 = vmax.f32 %v118_v30, 0.0  ;;  %v83_v43 = vmul.f32 %v1699_v6, %v44_v34  ;;  %v174_v44 = vpack.c.bf16 %v148_v37, %v147_v36 }
  0x16   :  { %v119_v45 = vadd.f32 %v1706_v9, %v80_v38  ;;  %v120_v46 = vadd.f32 %v1706_v9, %v81_v39  ;;  %v121_v48 = vadd.f32 %v1706_v9, %v82_v42  ;;  %v84_v56 = vmul.f32 %v1699_v6, %v45_v50 }
  0x17   :  { %1522 = vmatpush3.bf16.msra.mxu0 %v1581_v20  ;;  %v136_v20 = vadd.f32 %v1706_v9, %v97_v13  ;;  %v1812_v26 = vpack.c.bf16 %v166_v19, %v165_v18  ;;  %v175_v47 = vpack.c.bf16 %v150_v41, %v149_v40  ;;  %v85_v57 = vmul.f32 %v1699_v6, %v46_v51 }
  0x18   :  { %1523 = vmatprep.subr.bf16.mxu0 %v1582_v27  ;;  %v151_v54 = vmax.f32 %v119_v45, 0.0  ;;  %v152_v55 = vmax.f32 %v120_v46, 0.0  ;;  %v153_v58 = vmax.f32 %v121_v48, 0.0  ;;  %v86_v60 = vmul.f32 %v1699_v6, %v47_v52 }
  0x19   :  { %v123_v63 = vadd.f32 %v1706_v9, %v84_v56  ;;  %v124_v0 = vadd.f32 %v1706_v9, %v85_v57  ;;  %v88_v12 = vmul.f32 %v1699_v6, %v49_v4  ;;  %v89_v13 = vmul.f32 %v1699_v6, %v50_v5 }
  0x1a   :  { %v176_v62 = vpack.c.bf16 %v152_v55, %v151_v54  ;;  %v125_v2 = vadd.f32 %v1706_v9, %v86_v60  ;;  %v90_v16 = vmul.f32 %v1699_v6, %v51_v7  ;;  %v91_v17 = vmul.f32 %v1699_v6, %v52_v8 }
  0x1b   :  { %1524 = vmatpush3.bf16.msra.mxu0 %v1582_v27  ;;  %v168_v27 = vmax.f32 %v136_v20, 0.0  ;;  %v155_v10 = vmax.f32 %v123_v63, 0.0  ;;  %v156_v11 = vmax.f32 %v124_v0, 0.0  ;;  %v127_v19 = vadd.f32 %v1706_v9, %v88_v12 }
  0x1c   :  { %1525 = vmatprep.subr.bf16.mxu0 %v1583_v35  ;;  %v157_v14 = vmax.f32 %v125_v2, 0.0  ;;  %v128_v20 = vadd.f32 %v1706_v9, %v89_v13  ;;  %v130_v24 = vadd.f32 %v1706_v9, %v91_v17  ;;  %v1605_v17 = vld [vmem:[%s2086_s0] ss:$8 sps:$4 sm:$0xff]  }
  0x1d   :  { %v178_v18 = vpack.c.bf16 %v156_v11, %v155_v10  ;;  %v159_v25 = vmax.f32 %v127_v19, 0.0  ;;  %v1614_v19 = vld [vmem:[%s2086_s0 + $0x14] ss:$8 sps:$4 sm:$0xff]  }
  0x1e   :  { %v162_v29 = vmax.f32 %v130_v24, 0.0  ;;  %v1620_v24 = vld [vmem:[%s2086_s0 + $0x24] ss:$8 sps:$4 sm:$0xff]  }
  0x1f   :  { %1526 = vmatpush3.bf16.msra.mxu0 %v1583_v35  ;;  %v1828_v35 = vpack.c.bf16 %v168_v27, %v167_v23  ;;  %v129_v23 = vadd.f32 %v1706_v9, %v90_v16  ;;  %v160_v27 = vmax.f32 %v128_v20, 0.0  ;;  %v1584_v16 = vld [vmem:[%s2086_s0 + $0x40] ss:$8 sps:$4 sm:$0xff]   ;;  %v1589_v20 = vld [vmem:[%s2086_s0 + $0x50] ss:$8 sps:$4 sm:$0xff]  }
  0x21   :  { %v180_v30 = vpack.c.bf16 %v160_v27, %v159_v25  ;;  %v1592_v25 = vld [vmem:[%s2086_s0 + $0x60] ss:$8 sps:$4 sm:$0xff]  }
  0x22   :  { %1528 = vmatmul.mubr.bf16.vlgmr.msra.gmra.mrb[0].mxu0 %v170_v49  ;;  %v122_v49 = vadd.f32 %v1706_v9, %v83_v43  ;;  %v1622_v27 = vld [vmem:[%s2086_s0 + $0x20] ss:$8 sps:$4 sm:$0xff]  }
  0x23   :  { %1531 = vmatprep.mubr.bf16.mxu0 %v171_v53  ;;  %v48_v53 = vld [vmem:[%s2083_s1 + $0xa8] sm:$0xff] }
  0x24   :  { %v154_v59 = vmax.f32 %v122_v49, 0.0  ;;  %v87_v61 = vmul.f32 %v1699_v6, %v48_v53  ;;  %v1586_v6 = vld [vmem:[%s2086_s0 + $0x44] ss:$8 sps:$4 sm:$0xff]  }
  0x25   :  { %750 = vmatprep.mubr.bf16.mxu1 %v1586_v6  ;;  %v1596_v6 = vld [vmem:[%s2086_s0 + $0x84] ss:$8 sps:$4 sm:$0xff]  }
  0x26   :  { %v177_v1 = vpack.c.bf16 %v154_v59, %v153_v58  ;;  %v126_v3 = vadd.f32 %v1706_v9, %v87_v61  ;;  %v1607_v9 = vld [vmem:[%s2086_s0 + $0x4] ss:$8 sps:$4 sm:$0xff]  }
  0x28   :  { %v158_v15 = vmax.f32 %v126_v3, 0.0 }
  0x2a   :  { %1532 = vmatmul.mubr.bf16.gmra.mrb[4].mxu0 %v172_v21  ;;  %v179_v21 = vpack.c.bf16 %v158_v15, %v157_v14 }
  0x2b   :  { %1535 = vmatprep.mubr.bf16.mxu0 %v173_v28  ;;  %v161_v28 = vmax.f32 %v129_v23, 0.0  ;;  %v1590_v23 = vld [vmem:[%s2086_s0 + $0x64] ss:$8 sps:$4 sm:$0xff]  }
  0x2d   :  { %v181_v31 = vpack.c.bf16 %v162_v29, %v161_v28  ;;  %v1593_v28 = vld [vmem:[%s2086_s0 + $0x74] ss:$8 sps:$4 sm:$0xff]  }
  0x2e   :  { %v1626_v29 = vld [vmem:[%s2086_s0 + $0x34] ss:$8 sps:$4 sm:$0xff]  }
  0x32   :  { %1536 = vmatmul.mubr.bf16.gmra.mrb[8].mxu0 %v174_v44 }
  0x33   :  { %1539 = vmatprep.mubr.bf16.mxu0 %v175_v47 }
  0x3a   :  { %1540 = vmatmul.mubr.bf16.gmra.mrb[12].mxu0 %v176_v62 }
  0x3b   :  { %1543 = vmatprep.mubr.bf16.mxu0 %v177_v1 }
  0x42   :  { %1544 = vmatmul.mubr.bf16.gmra.mrb[16].mxu0 %v178_v18  ;;  %v1587_v18 = vld [vmem:[%s2086_s0 + $0x54] ss:$8 sps:$4 sm:$0xff]  }
  0x43   :  { %1547 = vmatprep.mubr.bf16.mxu0 %v179_v21  ;;  %v1616_v21 = vld [vmem:[%s2086_s0 + $0x10] ss:$8 sps:$4 sm:$0xff]  }
  0x4a   :  { %1548 = vmatmul.mubr.bf16.gmra.mrb[20].mxu0 %v180_v30  ;;  %v1595_v30 = vld [vmem:[%s2086_s0 + $0x70] ss:$8 sps:$4 sm:$0xff]  }
  0x4b   :  { %1551 = vmatprep.mubr.bf16.mxu0 %v181_v31  ;;  %v1628_v31 = vld [vmem:[%s2086_s0 + $0x30] ss:$8 sps:$4 sm:$0xff]  }
  0x52   :  { %1552 = vmatmul.mubr.bf16.gmra.mrb[24].mxu0 %v1808_v22 }
  0x53   :  { %1555 = vmatprep.mubr.bf16.mxu0 %v1812_v26 }
  0x5a   :  { %1556 = vmatmul.mubr.bf16.gmra.mrb[28].mxu0 %v1828_v35 }
  0x5b   :  { %718 = vmatprep.mubr.bf16.mxu0 %v1607_v9  ;;  %v1598_v9 = vld [vmem:[%s2086_s0 + $0x80] ss:$8 sps:$4 sm:$0xff]  }
  0xf5   :  { %v1529_v32 = vpop.f32.mrb[0].mxu0 }
  0xf6   :  { %v283_v33 = vpop.f32.mrb[1].mxu0 }
  0xf7   :  { %v1530_v34 = vpop.f32.mrb[2].mxu0 }
  0xf8   :  { %v511_v36 = vpack.c.bf16 %v1530_v34, %v1529_v32  ;;  %v286_v37 = vpop.f32.mrb[3].mxu0  ;;  %v1599_v32 = vld [vmem:[%s2086_s0 + $0x94] ss:$8 sps:$4 sm:$0xff]   ;;  %v1602_v34 = vld [vmem:[%s2086_s0 + $0xa4] ss:$8 sps:$4 sm:$0xff]  }
  0xf9   :  { %v510_v22 = vpack.c.bf16 %v286_v37, %v283_v33  ;;  %v1601_v33 = vld [vmem:[%s2086_s0 + $0x90] ss:$8 sps:$4 sm:$0xff]   ;;  %v1608_v37 = vld [vmem:[%s2086_s0 + $0xb4] ss:$8 sps:$4 sm:$0xff]  }
  0xfd   :  { %v1533_v38 = vpop.f32.mrb[4].mxu0 }
  0xfe   :  { %v299_v26 = vpop.f32.mrb[5].mxu0 }
  0xff   :  { %v1534_v39 = vpop.f32.mrb[6].mxu0 }
 0x100   :  { %v513_v35 = vpack.c.bf16 %v1534_v39, %v1533_v38  ;;  %v302_v40 = vpop.f32.mrb[7].mxu0  ;;  %v1611_v38 = vld [vmem:[%s2086_s0 + $0xc4] ss:$8 sps:$4 sm:$0xff]   ;;  %v1617_v39 = vld [vmem:[%s2086_s0 + $0xd4] ss:$8 sps:$4 sm:$0xff]  }
 0x101   :  { %v512_v41 = vpack.c.bf16 %v302_v40, %v299_v26  ;;  %v1613_v26 = vld [vmem:[%s2086_s0 + $0xc0] ss:$8 sps:$4 sm:$0xff]   ;;  %v1623_v40 = vld [vmem:[%s2086_s0 + $0xe4] ss:$8 sps:$4 sm:$0xff]  }
 0x105   :  { %v1537_v42 = vpop.f32.mrb[8].mxu0 }
 0x106   :  { %v315_v43 = vpop.f32.mrb[9].mxu0 }
 0x107   :  { %v1538_v44 = vpop.f32.mrb[10].mxu0 }
 0x108   :  { %v515_v45 = vpack.c.bf16 %v1538_v44, %v1537_v42  ;;  %v318_v46 = vpop.f32.mrb[11].mxu0  ;;  %v1629_v42 = vld [vmem:[%s2086_s0 + $0xf4] ss:$8 sps:$4 sm:$0xff]   ;;  %v1632_v44 = vmov 0.0  }
 0x109   :  { %v514_v47 = vpack.c.bf16 %v318_v46, %v315_v43  ;;  %v1631_v43 = vld [vmem:[%s2086_s0 + $0xf0] ss:$8 sps:$4 sm:$0xff]   ;;  %1188 = vst [vmem:[%s2087_s6 + $0x40] sm:$0xff] %v1632_v44  ;;  %1189 = vst [vmem:[%s2087_s6 + $0x48] sm:$0xff] %v1632_v44 }
 0x10a   :  { %1190 = vst [vmem:[%s2087_s6 + $0x50] sm:$0xff] %v1632_v44  ;;  %1191 = vst [vmem:[%s2087_s6 + $0x58] sm:$0xff] %v1632_v44 }
 0x10b   :  { %1192 = vst [vmem:[%s2087_s6 + $0x60] sm:$0xff] %v1632_v44  ;;  %1193 = vst [vmem:[%s2087_s6 + $0x68] sm:$0xff] %v1632_v44 }
 0x10c   :  { %1194 = vst [vmem:[%s2087_s6 + $0x70] sm:$0xff] %v1632_v44  ;;  %1195 = vst [vmem:[%s2087_s6 + $0x78] sm:$0xff] %v1632_v44 }
 0x10d   :  { %v1541_v48 = vpop.f32.mrb[12].mxu0  ;;  %1196 = vst [vmem:[%s2087_s6 + $0x80] sm:$0xff] %v1632_v44  ;;  %1197 = vst [vmem:[%s2087_s6 + $0x88] sm:$0xff] %v1632_v44 }
 0x10e   :  { %v331_v49 = vpop.f32.mrb[13].mxu0  ;;  %1198 = vst [vmem:[%s2087_s6 + $0x90] sm:$0xff] %v1632_v44  ;;  %1199 = vst [vmem:[%s2087_s6 + $0x98] sm:$0xff] %v1632_v44 }
 0x10f   :  { %v1542_v50 = vpop.f32.mrb[14].mxu0  ;;  %1200 = vst [vmem:[%s2087_s6 + $0xa0] sm:$0xff] %v1632_v44  ;;  %1201 = vst [vmem:[%s2087_s6 + $0xa8] sm:$0xff] %v1632_v44 }
 0x110   :  { %v517_v51 = vpack.c.bf16 %v1542_v50, %v1541_v48  ;;  %v334_v52 = vpop.f32.mrb[15].mxu0  ;;  %1202 = vst [vmem:[%s2087_s6 + $0xb0] sm:$0xff] %v1632_v44  ;;  %1203 = vst [vmem:[%s2087_s6 + $0xb8] sm:$0xff] %v1632_v44 }
 0x111   :  { %v516_v53 = vpack.c.bf16 %v334_v52, %v331_v49  ;;  %1204 = vst [vmem:[%s2087_s6 + $0xc0] sm:$0xff] %v1632_v44  ;;  %1205 = vst [vmem:[%s2087_s6 + $0xc8] sm:$0xff] %v1632_v44 }
 0x112   :  { %1182 = vst [vmem:[%s2087_s6 + $0x10] sm:$0xff] %v1632_v44  ;;  %1183 = vst [vmem:[%s2087_s6 + $0x18] sm:$0xff] %v1632_v44 }
 0x113   :  { %1206 = vst [vmem:[%s2087_s6 + $0xd0] sm:$0xff] %v1632_v44  ;;  %1207 = vst [vmem:[%s2087_s6 + $0xd8] sm:$0xff] %v1632_v44 }
 0x114   :  { %1184 = vst [vmem:[%s2087_s6 + $0x20] sm:$0xff] %v1632_v44  ;;  %1185 = vst [vmem:[%s2087_s6 + $0x28] sm:$0xff] %v1632_v44 }
 0x115   :  { %v1545_v54 = vpop.f32.mrb[16].mxu0  ;;  %1208 = vst [vmem:[%s2087_s6 + $0xe0] sm:$0xff] %v1632_v44  ;;  %1209 = vst [vmem:[%s2087_s6 + $0xe8] sm:$0xff] %v1632_v44 }
 0x116   :  { %v347_v55 = vpop.f32.mrb[17].mxu0  ;;  %1186 = vst [vmem:[%s2087_s6 + $0x30] sm:$0xff] %v1632_v44  ;;  %1187 = vst [vmem:[%s2087_s6 + $0x38] sm:$0xff] %v1632_v44 }
 0x117   :  { %v1546_v56 = vpop.f32.mrb[18].mxu0  ;;  %1210 = vst [vmem:[%s2087_s6 + $0xf0] sm:$0xff] %v1632_v44  ;;  %1211 = vst [vmem:[%s2087_s6 + $0xf8] sm:$0xff] %v1632_v44 }
 0x118   :  { %v519_v57 = vpack.c.bf16 %v1546_v56, %v1545_v54  ;;  %v350_v58 = vpop.f32.mrb[19].mxu0 }
 0x119   :  { %v518_v59 = vpack.c.bf16 %v350_v58, %v347_v55 }
 0x11b   :  { %1399 = vmatprep.subr.bf16.mxu0 %v518_v59  ;;  %1559 = vmatprep.subr.bf16.mxu1 %v518_v59 }
 0x11c   :  { %1400 = vmatpush3.bf16.msra.mxu0 %v510_v22  ;;  %1567 = vmatpush3.bf16.msra.mxu1 %v510_v22  ;;  %v1610_v22 = vld [vmem:[%s2086_s0 + $0xb0] ss:$8 sps:$4 sm:$0xff]  }
 0x11d   :  { %v1549_v60 = vpop.f32.mrb[20].mxu0  ;;  %1401 = vmatprep.subr.bf16.mxu0 %v519_v57  ;;  %1560 = vmatprep.subr.bf16.mxu1 %v519_v57 }
 0x11e   :  { %v363_v61 = vpop.f32.mrb[21].mxu0 }
 0x11f   :  { %v1550_v62 = vpop.f32.mrb[22].mxu0 }
 0x120   :  { %v521_v63 = vpack.c.bf16 %v1550_v62, %v1549_v60  ;;  %v366_v0 = vpop.f32.mrb[23].mxu0  ;;  %1402 = vmatpush3.bf16.msra.mxu0 %v511_v36  ;;  %1568 = vmatpush3.bf16.msra.mxu1 %v511_v36  ;;  %v1604_v36 = vld [vmem:[%s2086_s0 + $0xa0] ss:$8 sps:$4 sm:$0xff]  }
 0x121   :  { %v520_v1 = vpack.c.bf16 %v366_v0, %v363_v61 }
 0x123   :  { %1403 = vmatprep.subr.bf16.mxu0 %v520_v1  ;;  %1561 = vmatprep.subr.bf16.mxu1 %v520_v1 }
 0x124   :  { %1404 = vmatpush3.bf16.msra.mxu0 %v512_v41  ;;  %1569 = vmatpush3.bf16.msra.mxu1 %v512_v41  ;;  %v1625_v41 = vld [vmem:[%s2086_s0 + $0xe0] ss:$8 sps:$4 sm:$0xff]  }
 0x125   :  { %v1553_v2 = vpop.f32.mrb[24].mxu0  ;;  %1405 = vmatprep.subr.bf16.mxu0 %v521_v63  ;;  %1562 = vmatprep.subr.bf16.mxu1 %v521_v63 }
 0x126   :  { %v379_v3 = vpop.f32.mrb[25].mxu0 }
 0x127   :  { %v1554_v4 = vpop.f32.mrb[26].mxu0 }
 0x128   :  { %v523_v5 = vpack.c.bf16 %v1554_v4, %v1553_v2  ;;  %v382_v7 = vpop.f32.mrb[27].mxu0  ;;  %1406 = vmatpush3.bf16.msra.mxu0 %v513_v35  ;;  %1570 = vmatpush3.bf16.msra.mxu1 %v513_v35  ;;  %v1619_v35 = vld [vmem:[%s2086_s0 + $0xd0] ss:$8 sps:$4 sm:$0xff]  }
 0x129   :  { %v522_v8 = vpack.c.bf16 %v382_v7, %v379_v3 }
 0x12b   :  { %1407 = vmatprep.subr.bf16.mxu0 %v522_v8  ;;  %1563 = vmatprep.subr.bf16.mxu1 %v522_v8 }
 0x12c   :  { %1408 = vmatpush3.bf16.msra.mxu0 %v514_v47  ;;  %1571 = vmatpush3.bf16.msra.mxu1 %v514_v47 }
 0x12d   :  { %v1557_v10 = vpop.f32.mrb[28].mxu0  ;;  %1409 = vmatprep.subr.bf16.mxu0 %v523_v5  ;;  %1564 = vmatprep.subr.bf16.mxu1 %v523_v5 }
 0x12e   :  { %v395_v11 = vpop.f32.mrb[29].mxu0 }
 0x12f   :  { %v1558_v12 = vpop.f32.mrb[30].mxu0 }
 0x130   :  { %v525_v13 = vpack.c.bf16 %v1558_v12, %v1557_v10  ;;  %v398_v14 = vpop.f32.mrb[31].mxu0  ;;  %1410 = vmatpush3.bf16.msra.mxu0 %v515_v45  ;;  %1572 = vmatpush3.bf16.msra.mxu1 %v515_v45 }
 0x131   :  { %v524_v15 = vpack.c.bf16 %v398_v14, %v395_v11 }
 0x133   :  { %1411 = vmatprep.subr.bf16.mxu0 %v524_v15  ;;  %1565 = vmatprep.subr.bf16.mxu1 %v524_v15 }
 0x134   :  { %1412 = vmatpush3.bf16.msra.mxu0 %v516_v53  ;;  %1573 = vmatpush3.bf16.msra.mxu1 %v516_v53  ;;  %v1374_v53 = vld [vmem:[%s2088_s5] ss:$0 sm:$0xff] }
 0x135   :  { %1413 = vmatprep.subr.bf16.mxu0 %v525_v13  ;;  %1566 = vmatprep.subr.bf16.mxu1 %v525_v13 }
 0x138   :  { %1414 = vmatpush3.bf16.msra.mxu0 %v517_v51  ;;  %1574 = vmatpush3.bf16.msra.mxu1 %v517_v51 }
 0x13b   :  { %751 = vmatmul.mubr.bf16.vlgmr.msra.gmra.mrb[0].mxu1 %v1584_v16  ;;  %719 = vmatmul.mubr.bf16.vlgmr.msra.gmra.mrb[32].mxu0 %v1605_v17 }
 0x13c   :  { %758 = vmatprep.mubr.bf16.mxu1 %v1587_v18  ;;  %726 = vmatprep.mubr.bf16.mxu0 %v1614_v19 }
 0x143   :  { %759 = vmatmul.mubr.bf16.gmra.mrb[4].mxu1 %v1589_v20  ;;  %727 = vmatmul.mubr.bf16.gmra.mrb[36].mxu0 %v1616_v21 }
 0x144   :  { %766 = vmatprep.mubr.bf16.mxu1 %v1590_v23  ;;  %734 = vmatprep.mubr.bf16.mxu0 %v1620_v24 }
 0x14b   :  { %767 = vmatmul.mubr.bf16.gmra.mrb[8].mxu1 %v1592_v25  ;;  %735 = vmatmul.mubr.bf16.gmra.mrb[40].mxu0 %v1622_v27 }
 0x14c   :  { %774 = vmatprep.mubr.bf16.mxu1 %v1593_v28  ;;  %742 = vmatprep.mubr.bf16.mxu0 %v1626_v29 }
 0x153   :  { %775 = vmatmul.mubr.bf16.gmra.mrb[12].mxu1 %v1595_v30  ;;  %743 = vmatmul.mubr.bf16.gmra.mrb[44].mxu0 %v1628_v31 }
 0x154   :  { %782 = vmatprep.mubr.bf16.mxu1 %v1596_v6 }
 0x15b   :  { %783 = vmatmul.mubr.bf16.gmra.mrb[16].mxu1 %v1598_v9 }
 0x15c   :  { %790 = vmatprep.mubr.bf16.mxu1 %v1599_v32 }
 0x163   :  { %791 = vmatmul.mubr.bf16.gmra.mrb[20].mxu1 %v1601_v33 }
 0x164   :  { %798 = vmatprep.mubr.bf16.mxu1 %v1602_v34 }
 0x16b   :  { %799 = vmatmul.mubr.bf16.gmra.mrb[24].mxu1 %v1604_v36 }
 0x16c   :  { %806 = vmatprep.mubr.bf16.mxu1 %v1608_v37 }
 0x173   :  { %807 = vmatmul.mubr.bf16.gmra.mrb[28].mxu1 %v1610_v22 }
 0x174   :  { %814 = vmatprep.mubr.bf16.mxu1 %v1611_v38 }
 0x17b   :  { %815 = vmatmul.mubr.bf16.gmra.mrb[32].mxu1 %v1613_v26 }
 0x17c   :  { %822 = vmatprep.mubr.bf16.mxu1 %v1617_v39 }
 0x183   :  { %823 = vmatmul.mubr.bf16.gmra.mrb[36].mxu1 %v1619_v35 }
 0x184   :  { %830 = vmatprep.mubr.bf16.mxu1 %v1623_v40 }
 0x18b   :  { %831 = vmatmul.mubr.bf16.gmra.mrb[40].mxu1 %v1625_v41 }
 0x18c   :  { %838 = vmatprep.mubr.bf16.mxu1 %v1629_v42 }
 0x193   :  { %839 = vmatmul.mubr.bf16.gmra.mrb[44].mxu1 %v1631_v43 }
 0x20e   :  { %v1439_v45 = vpop.f32.mrb[0].mxu1  ;;  %v1415_v46 = vpop.f32.mrb[32].mxu0 }
 0x20f   :  { %v1440_v47 = vpop.f32.mrb[1].mxu1  ;;  %v1416_v48 = vpop.f32.mrb[33].mxu0 }
 0x210   :  { %v1442_v49 = vpop.f32.mrb[2].mxu1  ;;  %v1417_v50 = vadd.f32 %v1416_v48, %v1415_v46  ;;  %v1418_v51 = vpop.f32.mrb[34].mxu0 }
 0x211   :  { %v1443_v52 = vpop.f32.mrb[3].mxu1  ;;  %v1419_v54 = vpop.f32.mrb[35].mxu0 }
 0x212   :  { %v1420_v55 = vadd.f32 %v1419_v54, %v1418_v51  ;;  %v1052_v56 = vadd.f32 %v1417_v50, %v1374_v53 }
 0x214   :  { %1180 = vst [vmem:[%s2087_s6] sm:$0xff] %v1052_v56  ;;  %v1250_v58 = vmul.f32 %v1052_v56, %v1052_v56  ;;  %v1053_v59 = vadd.f32 %v1420_v55, %v1374_v53 }
 0x216   :  { %v1445_v57 = vpop.f32.mrb[4].mxu1  ;;  %v1421_v60 = vpop.f32.mrb[36].mxu0  ;;  %1181 = vst [vmem:[%s2087_s6 + $0x8] sm:$0xff] %v1053_v59  ;;  %v1212_v0 = vadd.f32 %v1053_v59, %v1052_v56  ;;  %v1251_v1 = vmul.f32 %v1053_v59, %v1053_v59 }
 0x217   :  { %v1446_v61 = vpop.f32.mrb[5].mxu1  ;;  %v1422_v62 = vpop.f32.mrb[37].mxu0 }
 0x218   :  { %v1448_v63 = vpop.f32.mrb[6].mxu1  ;;  %v1424_v2 = vpop.f32.mrb[38].mxu0  ;;  %v1243_v5 = vrot.slane %v1212_v0, 4  ;;  %v1282_v7 = vadd.f32 %v1251_v1, %v1250_v58 }
 0x219   :  { %v1449_v3 = vpop.f32.mrb[7].mxu1  ;;  %v1425_v4 = vpop.f32.mrb[39].mxu0 }
 0x21a   :  { %v1244_v8 = vadd.f32 %v1243_v5, %v1212_v0  ;;  %v1313_v10 = vrot.slane %v1282_v7, 4 }
 0x21c   :  { %v1245_v12 = vrot.slane %v1244_v8, 2  ;;  %v1314_v13 = vadd.f32 %v1313_v10, %v1282_v7 }
 0x21e   :  { %v1451_v11 = vpop.f32.mrb[8].mxu1  ;;  %v1427_v14 = vpop.f32.mrb[40].mxu0  ;;  %v1246_v18 = vadd.f32 %v1245_v12, %v1244_v8  ;;  %v1315_v19 = vrot.slane %v1314_v13, 2 }
 0x21f   :  { %v1452_v15 = vpop.f32.mrb[9].mxu1  ;;  %v1428_v16 = vpop.f32.mrb[41].mxu0 }
 0x220   :  { %v1454_v17 = vpop.f32.mrb[10].mxu1  ;;  %v1430_v20 = vpop.f32.mrb[42].mxu0  ;;  %v1247_v24 = vrot.slane %v1246_v18, 1  ;;  %v1316_v25 = vadd.f32 %v1315_v19, %v1314_v13 }
 0x221   :  { %v1455_v21 = vpop.f32.mrb[11].mxu1  ;;  %v1431_v23 = vpop.f32.mrb[43].mxu0 }
 0x222   :  { %v1248_v27 = vadd.f32 %v1247_v24, %v1246_v18  ;;  %v1317_v28 = vrot.slane %v1316_v25, 1 }
 0x224   :  { %1249 = vst [vmem:[%s2089_s7] sm:$0x1] %v1248_v27  ;;  %v1318_v30 = vadd.f32 %v1317_v28, %v1316_v25 }
 0x226   :  { %v1457_v29 = vpop.f32.mrb[12].mxu1  ;;  %v1433_v31 = vpop.f32.mrb[44].mxu0  ;;  %1319 = vst [vmem:[%s2090_s8] sm:$0x1] %v1318_v30 }
 0x227   :  { %v1458_v6 = vpop.f32.mrb[13].mxu1  ;;  %v1434_v9 = vpop.f32.mrb[45].mxu0 }
 0x228   :  { %v1460_v32 = vpop.f32.mrb[14].mxu1  ;;  %v1436_v33 = vpop.f32.mrb[46].mxu0 }
 0x229   :  { %v1461_v34 = vpop.f32.mrb[15].mxu1  ;;  %v1437_v36 = vpop.f32.mrb[47].mxu0 }
 0x22e   :  { %v1463_v37 = vpop.f32.mrb[16].mxu1 }
 0x22f   :  { %v1464_v22 = vpop.f32.mrb[17].mxu1 }
 0x230   :  { %v1466_v38 = vpop.f32.mrb[18].mxu1 }
 0x231   :  { %v1467_v26 = vpop.f32.mrb[19].mxu1 }
 0x236   :  { %v1469_v39 = vpop.f32.mrb[20].mxu1 }
 0x237   :  { %v1470_v35 = vpop.f32.mrb[21].mxu1 }
 0x238   :  { %v1472_v40 = vpop.f32.mrb[22].mxu1 }
 0x239   :  { %v1473_v41 = vpop.f32.mrb[23].mxu1 }
 0x23e   :  { %v1475_v42 = vpop.f32.mrb[24].mxu1 }
 0x23f   :  { %v1476_v43 = vpop.f32.mrb[25].mxu1 }
 0x240   :  { %v1478_v44 = vpop.f32.mrb[26].mxu1 }
 0x241   :  { %v1479_v45 = vpop.f32.mrb[27].mxu1 }
 0x246   :  { %v1481_v46 = vpop.f32.mrb[28].mxu1 }
 0x247   :  { %v1482_v47 = vpop.f32.mrb[29].mxu1 }
 0x248   :  { %v1484_v48 = vpop.f32.mrb[30].mxu1 }
 0x249   :  { %v1485_v49 = vpop.f32.mrb[31].mxu1 }
 0x24e   :  { %v1487_v50 = vpop.f32.mrb[32].mxu1 }
 0x24f   :  { %v1488_v51 = vpop.f32.mrb[33].mxu1 }
 0x250   :  { %v1490_v52 = vpop.f32.mrb[34].mxu1 }
 0x251   :  { %v1491_v53 = vpop.f32.mrb[35].mxu1 }
 0x256   :  { %v1493_v54 = vpop.f32.mrb[36].mxu1 }
 0x257   :  { %v1494_v55 = vpop.f32.mrb[37].mxu1 }
 0x258   :  { %v1496_v56 = vpop.f32.mrb[38].mxu1 }
 0x259   :  { %v1497_v57 = vpop.f32.mrb[39].mxu1 }
 0x25e   :  { %v1499_v58 = vpop.f32.mrb[40].mxu1 }
 0x25f   :  { %v1500_v59 = vpop.f32.mrb[41].mxu1 }
 0x260   :  { %v1502_v60 = vpop.f32.mrb[42].mxu1 }
 0x261   :  { %v1503_v61 = vpop.f32.mrb[43].mxu1 }
 0x266   :  { %v1505_v62 = vpop.f32.mrb[44].mxu1 }
 0x267   :  { %v1506_v63 = vpop.f32.mrb[45].mxu1 }
 0x268   :  { %v1508_v0 = vpop.f32.mrb[46].mxu1 }
 0x269   :  { %v1509_v1 = vpop.f32.mrb[47].mxu1 }

// kernel: _lambda_.4
= control target key start
LH: loop header
LB: loop body
LE: loop exit
PB: predicated region body
PF: predicated region fallthrough
CT: control target
= control target key end

     0   :  { %s1887_s2 = inlined_call_operand.vmem [shape: f32[1,128], index: 2, kind: input, shape index: {}]   ;;  %s1888_s3 = inlined_call_operand.vmem [shape: f32[1,128], index: 3, kind: input, shape index: {}, may-alias: {3,5}]   ;;  %s1889_s4 = inlined_call_operand.vmem [shape: bf16[128,128], index: 4, kind: input, shape index: {}]   ;;  %s1890_s1 = inlined_call_operand.vmem [shape: f32[256,128], index: 1, kind: input, shape index: {}]   ;;  %s1891_s0 = inlined_call_operand.vmem [shape: bf16[256,256], index: 0, kind: input, shape index: {}]   ;;  %s1892_s6 = inlined_call_operand.vmem [shape: f32[256,128], index: 6, kind: output, shape index: {0}]   ;;  %s1893_s5 = inlined_call_operand.vmem [shape: f32[1,128], index: 5, kind: input, shape index: {}, may-alias: {3,5}]   ;;  %s1894_s7 = inlined_call_operand.vmem [shape: f32[1,1,128], index: 7, kind: output, shape index: {1}]   ;;  %s1895_s8 = inlined_call_operand.vmem [shape: f32[1,1,128], index: 8, kind: output, shape index: {2}]  }
   0x1   :  { %v1464_v0 = vld [vmem:[%s1889_s4] sm:$0xff]   ;;  %v1465_v1 = vld [vmem:[%s1889_s4 + $0x8] sm:$0xff]   ;;  %v1466_v2 = vld [vmem:[%s1889_s4 + $0x10] sm:$0xff]  }
   0x2   :  { %1399 = vmatprep.subr.bf16.mxu0 %v1464_v0  ;;  %v1467_v3 = vld [vmem:[%s1889_s4 + $0x18] sm:$0xff]   ;;  %v27_v4 = vld [vmem:[%s1890_s1] sm:$0xff]  ;;  %v28_v5 = vld [vmem:[%s1890_s1 + $0x8] sm:$0xff] }
   0x3   :  { %1400 = vmatpush3.bf16.msra.mxu0 %v1464_v0  ;;  %v59_v6 = vpack.c.bf16 %v28_v5, %v27_v4  ;;  %v1468_v7 = vld [vmem:[%s1889_s4 + $0x20] sm:$0xff]   ;;  %v1469_v8 = vld [vmem:[%s1889_s4 + $0x28] sm:$0xff]   ;;  %v1470_v9 = vld [vmem:[%s1889_s4 + $0x30] sm:$0xff]  }
   0x4   :  { %1401 = vmatprep.subr.bf16.mxu0 %v1465_v1  ;;  %v1471_v10 = vld [vmem:[%s1889_s4 + $0x38] sm:$0xff]   ;;  %v29_v11 = vld [vmem:[%s1890_s1 + $0x10] sm:$0xff]  ;;  %v31_v13 = vld [vmem:[%s1890_s1 + $0x20] sm:$0xff] }
   0x5   :  { %1415 = vmatprep.mubr.bf16.mxu0 %v59_v6  ;;  %v30_v12 = vld [vmem:[%s1890_s1 + $0x18] sm:$0xff]  ;;  %v32_v14 = vld [vmem:[%s1890_s1 + $0x28] sm:$0xff]  ;;  %v33_v17 = vld [vmem:[%s1890_s1 + $0x30] sm:$0xff] }
   0x6   :  { %v60_v15 = vpack.c.bf16 %v30_v12, %v29_v11  ;;  %v61_v16 = vpack.c.bf16 %v32_v14, %v31_v13  ;;  %v34_v18 = vld [vmem:[%s1890_s1 + $0x38] sm:$0xff]  ;;  %v35_v19 = vld [vmem:[%s1890_s1 + $0x40] sm:$0xff]  ;;  %v36_v20 = vld [vmem:[%s1890_s1 + $0x48] sm:$0xff] }
   0x7   :  { %1402 = vmatpush3.bf16.msra.mxu0 %v1465_v1  ;;  %v62_v21 = vpack.c.bf16 %v34_v18, %v33_v17  ;;  %v63_v22 = vpack.c.bf16 %v36_v20, %v35_v19  ;;  %v37_v23 = vld [vmem:[%s1890_s1 + $0x50] sm:$0xff]  ;;  %v38_v24 = vld [vmem:[%s1890_s1 + $0x58] sm:$0xff]  ;;  %v39_v25 = vld [vmem:[%s1890_s1 + $0x60] sm:$0xff] }
   0x8   :  { %1403 = vmatprep.subr.bf16.mxu0 %v1466_v2  ;;  %v40_v26 = vld [vmem:[%s1890_s1 + $0x68] sm:$0xff]  ;;  %v64_v27 = vpack.c.bf16 %v38_v24, %v37_v23  ;;  %v41_v29 = vld [vmem:[%s1890_s1 + $0x70] sm:$0xff]  ;;  %v42_v30 = vld [vmem:[%s1890_s1 + $0x78] sm:$0xff] }
   0x9   :  { %v65_v28 = vpack.c.bf16 %v40_v26, %v39_v25  ;;  %v43_v31 = vld [vmem:[%s1890_s1 + $0x80] sm:$0xff]  ;;  %v44_v32 = vld [vmem:[%s1890_s1 + $0x88] sm:$0xff]  ;;  %v66_v33 = vpack.c.bf16 %v42_v30, %v41_v29  ;;  %v45_v35 = vld [vmem:[%s1890_s1 + $0x90] sm:$0xff] }
   0xa   :  { %v67_v34 = vpack.c.bf16 %v44_v32, %v43_v31  ;;  %v46_v36 = vld [vmem:[%s1890_s1 + $0x98] sm:$0xff]  ;;  %v47_v37 = vld [vmem:[%s1890_s1 + $0xa0] sm:$0xff]  ;;  %v48_v38 = vld [vmem:[%s1890_s1 + $0xa8] sm:$0xff] }
   0xb   :  { %1404 = vmatpush3.bf16.msra.mxu0 %v1466_v2  ;;  %v68_v39 = vpack.c.bf16 %v46_v36, %v45_v35  ;;  %v69_v40 = vpack.c.bf16 %v48_v38, %v47_v37  ;;  %v49_v41 = vld [vmem:[%s1890_s1 + $0xb0] sm:$0xff]  ;;  %v50_v42 = vld [vmem:[%s1890_s1 + $0xb8] sm:$0xff]  ;;  %v51_v43 = vld [vmem:[%s1890_s1 + $0xc0] sm:$0xff] }
   0xc   :  { %1405 = vmatprep.subr.bf16.mxu0 %v1467_v3  ;;  %v52_v44 = vld [vmem:[%s1890_s1 + $0xc8] sm:$0xff]  ;;  %v70_v45 = vpack.c.bf16 %v50_v42, %v49_v41  ;;  %v53_v47 = vld [vmem:[%s1890_s1 + $0xd0] sm:$0xff]  ;;  %v54_v48 = vld [vmem:[%s1890_s1 + $0xd8] sm:$0xff] }
   0xd   :  { %v71_v46 = vpack.c.bf16 %v52_v44, %v51_v43  ;;  %v55_v49 = vld [vmem:[%s1890_s1 + $0xe0] sm:$0xff]  ;;  %v56_v50 = vld [vmem:[%s1890_s1 + $0xe8] sm:$0xff]  ;;  %v72_v51 = vpack.c.bf16 %v54_v48, %v53_v47  ;;  %v57_v53 = vld [vmem:[%s1890_s1 + $0xf0] sm:$0xff] }
   0xe   :  { %v73_v52 = vpack.c.bf16 %v56_v50, %v55_v49  ;;  %v58_v54 = vld [vmem:[%s1890_s1 + $0xf8] sm:$0xff]  ;;  %v1474_v56 = vld [vmem:[%s1891_s0 + $0x44] ss:$8 sps:$4 sm:$0xff]   ;;  %v1472_v42 = vld [vmem:[%s1891_s0 + $0x40] ss:$8 sps:$4 sm:$0xff]  }
   0xf   :  { %1406 = vmatpush3.bf16.msra.mxu0 %v1467_v3  ;;  %v74_v55 = vpack.c.bf16 %v58_v54, %v57_v53  ;;  %640 = vmatprep.mubr.bf16.mxu1 %v1474_v56  ;;  %v1495_v57 = vld [vmem:[%s1891_s0 + $0x4] ss:$8 sps:$4 sm:$0xff]   ;;  %v1493_v43 = vld [vmem:[%s1891_s0] ss:$8 sps:$4 sm:$0xff]   ;;  %v1475_v44 = vld [vmem:[%s1891_s0 + $0x54] ss:$8 sps:$4 sm:$0xff]  }
  0x10   :  { %1407 = vmatprep.subr.bf16.mxu0 %v1468_v7  ;;  %v1504_v47 = vld [vmem:[%s1891_s0 + $0x10] ss:$8 sps:$4 sm:$0xff]   ;;  %v1478_v48 = vld [vmem:[%s1891_s0 + $0x64] ss:$8 sps:$4 sm:$0xff]   ;;  %v1480_v50 = vld [vmem:[%s1891_s0 + $0x60] ss:$8 sps:$4 sm:$0xff]  }
  0x11   :  { %v1508_v49 = vld [vmem:[%s1891_s0 + $0x24] ss:$8 sps:$4 sm:$0xff]   ;;  %v1514_v53 = vld [vmem:[%s1891_s0 + $0x34] ss:$8 sps:$4 sm:$0xff]   ;;  %v1483_v54 = vld [vmem:[%s1891_s0 + $0x70] ss:$8 sps:$4 sm:$0xff]  }
  0x12   :  { %v1484_v56 = vld [vmem:[%s1891_s0 + $0x84] ss:$8 sps:$4 sm:$0xff]  }
  0x13   :  { %1408 = vmatpush3.bf16.msra.mxu0 %v1468_v7 }
  0x14   :  { %1409 = vmatprep.subr.bf16.mxu0 %v1469_v8 }
  0x17   :  { %1410 = vmatpush3.bf16.msra.mxu0 %v1469_v8 }
  0x18   :  { %1411 = vmatprep.subr.bf16.mxu0 %v1470_v9 }
  0x1b   :  { %1412 = vmatpush3.bf16.msra.mxu0 %v1470_v9 }
  0x1c   :  { %1413 = vmatprep.subr.bf16.mxu0 %v1471_v10 }
  0x1f   :  { %1414 = vmatpush3.bf16.msra.mxu0 %v1471_v10 }
  0x22   :  { %1416 = vmatmul.mubr.bf16.vlgmr.msra.gmra.mrb[0].mxu0 %v60_v15 }
  0x23   :  { %1419 = vmatprep.mubr.bf16.mxu0 %v61_v16 }
  0x2a   :  { %1420 = vmatmul.mubr.bf16.gmra.mrb[4].mxu0 %v62_v21 }
  0x2b   :  { %1423 = vmatprep.mubr.bf16.mxu0 %v63_v22 }
  0x32   :  { %1424 = vmatmul.mubr.bf16.gmra.mrb[8].mxu0 %v64_v27 }
  0x33   :  { %1427 = vmatprep.mubr.bf16.mxu0 %v65_v28 }
  0x3a   :  { %1428 = vmatmul.mubr.bf16.gmra.mrb[12].mxu0 %v66_v33 }
  0x3b   :  { %1431 = vmatprep.mubr.bf16.mxu0 %v67_v34 }
  0x42   :  { %1432 = vmatmul.mubr.bf16.gmra.mrb[16].mxu0 %v68_v39 }
  0x43   :  { %1435 = vmatprep.mubr.bf16.mxu0 %v69_v40 }
  0x4a   :  { %1436 = vmatmul.mubr.bf16.gmra.mrb[20].mxu0 %v70_v45  ;;  %v1502_v45 = vld [vmem:[%s1891_s0 + $0x14] ss:$8 sps:$4 sm:$0xff]  }
  0x4b   :  { %1439 = vmatprep.mubr.bf16.mxu0 %v71_v46  ;;  %v1477_v46 = vld [vmem:[%s1891_s0 + $0x50] ss:$8 sps:$4 sm:$0xff]  }
  0x52   :  { %1440 = vmatmul.mubr.bf16.gmra.mrb[24].mxu0 %v72_v51  ;;  %v1510_v51 = vld [vmem:[%s1891_s0 + $0x20] ss:$8 sps:$4 sm:$0xff]  }
  0x53   :  { %1443 = vmatprep.mubr.bf16.mxu0 %v73_v52  ;;  %v1481_v52 = vld [vmem:[%s1891_s0 + $0x74] ss:$8 sps:$4 sm:$0xff]  }
  0x5a   :  { %1444 = vmatmul.mubr.bf16.gmra.mrb[28].mxu0 %v74_v55  ;;  %v1516_v55 = vld [vmem:[%s1891_s0 + $0x30] ss:$8 sps:$4 sm:$0xff]  }
  0x5b   :  { %608 = vmatprep.mubr.bf16.mxu0 %v1495_v57  ;;  %v1486_v57 = vld [vmem:[%s1891_s0 + $0x80] ss:$8 sps:$4 sm:$0xff]  }
  0xf5   :  { %v1417_v58 = vpop.f32.mrb[0].mxu0 }
  0xf6   :  { %v173_v59 = vpop.f32.mrb[1].mxu0 }
  0xf7   :  { %v1418_v60 = vpop.f32.mrb[2].mxu0 }
  0xf8   :  { %v401_v61 = vpack.c.bf16 %v1418_v60, %v1417_v58  ;;  %v176_v62 = vpop.f32.mrb[3].mxu0  ;;  %v1487_v58 = vld [vmem:[%s1891_s0 + $0x94] ss:$8 sps:$4 sm:$0xff]   ;;  %v1490_v60 = vld [vmem:[%s1891_s0 + $0xa4] ss:$8 sps:$4 sm:$0xff]  }
  0xf9   :  { %v400_v63 = vpack.c.bf16 %v176_v62, %v173_v59  ;;  %v1489_v59 = vld [vmem:[%s1891_s0 + $0x90] ss:$8 sps:$4 sm:$0xff]   ;;  %v1496_v62 = vld [vmem:[%s1891_s0 + $0xb4] ss:$8 sps:$4 sm:$0xff]  }
  0xfd   :  { %v1421_v0 = vpop.f32.mrb[4].mxu0 }
  0xfe   :  { %v189_v1 = vpop.f32.mrb[5].mxu0 }
  0xff   :  { %v1422_v2 = vpop.f32.mrb[6].mxu0 }
 0x100   :  { %v403_v3 = vpack.c.bf16 %v1422_v2, %v1421_v0  ;;  %v192_v4 = vpop.f32.mrb[7].mxu0  ;;  %v1499_v0 = vld [vmem:[%s1891_s0 + $0xc4] ss:$8 sps:$4 sm:$0xff]   ;;  %v1505_v2 = vld [vmem:[%s1891_s0 + $0xd4] ss:$8 sps:$4 sm:$0xff]  }
 0x101   :  { %v402_v5 = vpack.c.bf16 %v192_v4, %v189_v1  ;;  %v1501_v1 = vld [vmem:[%s1891_s0 + $0xc0] ss:$8 sps:$4 sm:$0xff]   ;;  %v1511_v4 = vld [vmem:[%s1891_s0 + $0xe4] ss:$8 sps:$4 sm:$0xff]  }
 0x105   :  { %v1425_v6 = vpop.f32.mrb[8].mxu0 }
 0x106   :  { %v205_v7 = vpop.f32.mrb[9].mxu0 }
 0x107   :  { %v1426_v8 = vpop.f32.mrb[10].mxu0 }
 0x108   :  { %v405_v9 = vpack.c.bf16 %v1426_v8, %v1425_v6  ;;  %v208_v10 = vpop.f32.mrb[11].mxu0  ;;  %v1517_v6 = vld [vmem:[%s1891_s0 + $0xf4] ss:$8 sps:$4 sm:$0xff]   ;;  %v1520_v8 = vmov 0.0  }
 0x109   :  { %v404_v11 = vpack.c.bf16 %v208_v10, %v205_v7  ;;  %v1519_v7 = vld [vmem:[%s1891_s0 + $0xf0] ss:$8 sps:$4 sm:$0xff]   ;;  %1078 = vst [vmem:[%s1892_s6 + $0x40] sm:$0xff] %v1520_v8  ;;  %1079 = vst [vmem:[%s1892_s6 + $0x48] sm:$0xff] %v1520_v8 }
 0x10a   :  { %1080 = vst [vmem:[%s1892_s6 + $0x50] sm:$0xff] %v1520_v8  ;;  %1081 = vst [vmem:[%s1892_s6 + $0x58] sm:$0xff] %v1520_v8 }
 0x10b   :  { %1082 = vst [vmem:[%s1892_s6 + $0x60] sm:$0xff] %v1520_v8  ;;  %1083 = vst [vmem:[%s1892_s6 + $0x68] sm:$0xff] %v1520_v8 }
 0x10c   :  { %1084 = vst [vmem:[%s1892_s6 + $0x70] sm:$0xff] %v1520_v8  ;;  %1085 = vst [vmem:[%s1892_s6 + $0x78] sm:$0xff] %v1520_v8 }
 0x10d   :  { %v1429_v12 = vpop.f32.mrb[12].mxu0  ;;  %1086 = vst [vmem:[%s1892_s6 + $0x80] sm:$0xff] %v1520_v8  ;;  %1087 = vst [vmem:[%s1892_s6 + $0x88] sm:$0xff] %v1520_v8 }
 0x10e   :  { %v221_v13 = vpop.f32.mrb[13].mxu0  ;;  %1088 = vst [vmem:[%s1892_s6 + $0x90] sm:$0xff] %v1520_v8  ;;  %1089 = vst [vmem:[%s1892_s6 + $0x98] sm:$0xff] %v1520_v8 }
 0x10f   :  { %v1430_v14 = vpop.f32.mrb[14].mxu0  ;;  %1090 = vst [vmem:[%s1892_s6 + $0xa0] sm:$0xff] %v1520_v8  ;;  %1091 = vst [vmem:[%s1892_s6 + $0xa8] sm:$0xff] %v1520_v8 }
 0x110   :  { %v407_v15 = vpack.c.bf16 %v1430_v14, %v1429_v12  ;;  %v224_v16 = vpop.f32.mrb[15].mxu0  ;;  %1092 = vst [vmem:[%s1892_s6 + $0xb0] sm:$0xff] %v1520_v8  ;;  %1093 = vst [vmem:[%s1892_s6 + $0xb8] sm:$0xff] %v1520_v8 }
 0x111   :  { %v406_v17 = vpack.c.bf16 %v224_v16, %v221_v13  ;;  %1094 = vst [vmem:[%s1892_s6 + $0xc0] sm:$0xff] %v1520_v8  ;;  %1095 = vst [vmem:[%s1892_s6 + $0xc8] sm:$0xff] %v1520_v8 }
 0x112   :  { %1072 = vst [vmem:[%s1892_s6 + $0x10] sm:$0xff] %v1520_v8  ;;  %1073 = vst [vmem:[%s1892_s6 + $0x18] sm:$0xff] %v1520_v8 }
 0x113   :  { %1096 = vst [vmem:[%s1892_s6 + $0xd0] sm:$0xff] %v1520_v8  ;;  %1097 = vst [vmem:[%s1892_s6 + $0xd8] sm:$0xff] %v1520_v8 }
 0x114   :  { %1074 = vst [vmem:[%s1892_s6 + $0x20] sm:$0xff] %v1520_v8  ;;  %1075 = vst [vmem:[%s1892_s6 + $0x28] sm:$0xff] %v1520_v8 }
 0x115   :  { %v1433_v18 = vpop.f32.mrb[16].mxu0  ;;  %1098 = vst [vmem:[%s1892_s6 + $0xe0] sm:$0xff] %v1520_v8  ;;  %1099 = vst [vmem:[%s1892_s6 + $0xe8] sm:$0xff] %v1520_v8 }
 0x116   :  { %v237_v19 = vpop.f32.mrb[17].mxu0  ;;  %1076 = vst [vmem:[%s1892_s6 + $0x30] sm:$0xff] %v1520_v8  ;;  %1077 = vst [vmem:[%s1892_s6 + $0x38] sm:$0xff] %v1520_v8 }
 0x117   :  { %v1434_v20 = vpop.f32.mrb[18].mxu0  ;;  %1100 = vst [vmem:[%s1892_s6 + $0xf0] sm:$0xff] %v1520_v8  ;;  %1101 = vst [vmem:[%s1892_s6 + $0xf8] sm:$0xff] %v1520_v8 }
 0x118   :  { %v409_v21 = vpack.c.bf16 %v1434_v20, %v1433_v18  ;;  %v240_v22 = vpop.f32.mrb[19].mxu0 }
 0x119   :  { %v408_v23 = vpack.c.bf16 %v240_v22, %v237_v19 }
 0x11b   :  { %1287 = vmatprep.subr.bf16.mxu0 %v408_v23  ;;  %1447 = vmatprep.subr.bf16.mxu1 %v408_v23 }
 0x11c   :  { %1288 = vmatpush3.bf16.msra.mxu0 %v400_v63  ;;  %1455 = vmatpush3.bf16.msra.mxu1 %v400_v63  ;;  %v1498_v63 = vld [vmem:[%s1891_s0 + $0xb0] ss:$8 sps:$4 sm:$0xff]  }
 0x11d   :  { %v1437_v24 = vpop.f32.mrb[20].mxu0  ;;  %1289 = vmatprep.subr.bf16.mxu0 %v409_v21  ;;  %1448 = vmatprep.subr.bf16.mxu1 %v409_v21 }
 0x11e   :  { %v253_v25 = vpop.f32.mrb[21].mxu0 }
 0x11f   :  { %v1438_v26 = vpop.f32.mrb[22].mxu0 }
 0x120   :  { %v411_v27 = vpack.c.bf16 %v1438_v26, %v1437_v24  ;;  %v256_v28 = vpop.f32.mrb[23].mxu0  ;;  %1290 = vmatpush3.bf16.msra.mxu0 %v401_v61  ;;  %1456 = vmatpush3.bf16.msra.mxu1 %v401_v61  ;;  %v1492_v61 = vld [vmem:[%s1891_s0 + $0xa0] ss:$8 sps:$4 sm:$0xff]  }
 0x121   :  { %v410_v29 = vpack.c.bf16 %v256_v28, %v253_v25 }
 0x123   :  { %1291 = vmatprep.subr.bf16.mxu0 %v410_v29  ;;  %1449 = vmatprep.subr.bf16.mxu1 %v410_v29 }
 0x124   :  { %1292 = vmatpush3.bf16.msra.mxu0 %v402_v5  ;;  %1457 = vmatpush3.bf16.msra.mxu1 %v402_v5  ;;  %v1513_v5 = vld [vmem:[%s1891_s0 + $0xe0] ss:$8 sps:$4 sm:$0xff]  }
 0x125   :  { %v1441_v30 = vpop.f32.mrb[24].mxu0  ;;  %1293 = vmatprep.subr.bf16.mxu0 %v411_v27  ;;  %1450 = vmatprep.subr.bf16.mxu1 %v411_v27 }
 0x126   :  { %v269_v31 = vpop.f32.mrb[25].mxu0 }
 0x127   :  { %v1442_v32 = vpop.f32.mrb[26].mxu0 }
 0x128   :  { %v413_v33 = vpack.c.bf16 %v1442_v32, %v1441_v30  ;;  %v272_v34 = vpop.f32.mrb[27].mxu0  ;;  %1294 = vmatpush3.bf16.msra.mxu0 %v403_v3  ;;  %1458 = vmatpush3.bf16.msra.mxu1 %v403_v3  ;;  %v1507_v3 = vld [vmem:[%s1891_s0 + $0xd0] ss:$8 sps:$4 sm:$0xff]  }
 0x129   :  { %v412_v35 = vpack.c.bf16 %v272_v34, %v269_v31 }
 0x12b   :  { %1295 = vmatprep.subr.bf16.mxu0 %v412_v35  ;;  %1451 = vmatprep.subr.bf16.mxu1 %v412_v35 }
 0x12c   :  { %1296 = vmatpush3.bf16.msra.mxu0 %v404_v11  ;;  %1459 = vmatpush3.bf16.msra.mxu1 %v404_v11 }
 0x12d   :  { %v1445_v36 = vpop.f32.mrb[28].mxu0  ;;  %1297 = vmatprep.subr.bf16.mxu0 %v413_v33  ;;  %1452 = vmatprep.subr.bf16.mxu1 %v413_v33 }
 0x12e   :  { %v285_v37 = vpop.f32.mrb[29].mxu0 }
 0x12f   :  { %v1446_v38 = vpop.f32.mrb[30].mxu0 }
 0x130   :  { %v415_v39 = vpack.c.bf16 %v1446_v38, %v1445_v36  ;;  %v288_v40 = vpop.f32.mrb[31].mxu0  ;;  %1298 = vmatpush3.bf16.msra.mxu0 %v405_v9  ;;  %1460 = vmatpush3.bf16.msra.mxu1 %v405_v9 }
 0x131   :  { %v414_v41 = vpack.c.bf16 %v288_v40, %v285_v37 }
 0x133   :  { %1299 = vmatprep.subr.bf16.mxu0 %v414_v41  ;;  %1453 = vmatprep.subr.bf16.mxu1 %v414_v41 }
 0x134   :  { %1300 = vmatpush3.bf16.msra.mxu0 %v406_v17  ;;  %1461 = vmatpush3.bf16.msra.mxu1 %v406_v17  ;;  %v1262_v17 = vld [vmem:[%s1893_s5] ss:$0 sm:$0xff] }
 0x135   :  { %1301 = vmatprep.subr.bf16.mxu0 %v415_v39  ;;  %1454 = vmatprep.subr.bf16.mxu1 %v415_v39 }
 0x138   :  { %1302 = vmatpush3.bf16.msra.mxu0 %v407_v15  ;;  %1462 = vmatpush3.bf16.msra.mxu1 %v407_v15 }
 0x13b   :  { %641 = vmatmul.mubr.bf16.vlgmr.msra.gmra.mrb[0].mxu1 %v1472_v42  ;;  %609 = vmatmul.mubr.bf16.vlgmr.msra.gmra.mrb[32].mxu0 %v1493_v43 }
 0x13c   :  { %648 = vmatprep.mubr.bf16.mxu1 %v1475_v44  ;;  %616 = vmatprep.mubr.bf16.mxu0 %v1502_v45 }
 0x143   :  { %649 = vmatmul.mubr.bf16.gmra.mrb[4].mxu1 %v1477_v46  ;;  %617 = vmatmul.mubr.bf16.gmra.mrb[36].mxu0 %v1504_v47 }
 0x144   :  { %656 = vmatprep.mubr.bf16.mxu1 %v1478_v48  ;;  %624 = vmatprep.mubr.bf16.mxu0 %v1508_v49 }
 0x14b   :  { %657 = vmatmul.mubr.bf16.gmra.mrb[8].mxu1 %v1480_v50  ;;  %625 = vmatmul.mubr.bf16.gmra.mrb[40].mxu0 %v1510_v51 }
 0x14c   :  { %664 = vmatprep.mubr.bf16.mxu1 %v1481_v52  ;;  %632 = vmatprep.mubr.bf16.mxu0 %v1514_v53 }
 0x153   :  { %665 = vmatmul.mubr.bf16.gmra.mrb[12].mxu1 %v1483_v54  ;;  %633 = vmatmul.mubr.bf16.gmra.mrb[44].mxu0 %v1516_v55 }
 0x154   :  { %672 = vmatprep.mubr.bf16.mxu1 %v1484_v56 }
 0x15b   :  { %673 = vmatmul.mubr.bf16.gmra.mrb[16].mxu1 %v1486_v57 }
 0x15c   :  { %680 = vmatprep.mubr.bf16.mxu1 %v1487_v58 }
 0x163   :  { %681 = vmatmul.mubr.bf16.gmra.mrb[20].mxu1 %v1489_v59 }
 0x164   :  { %688 = vmatprep.mubr.bf16.mxu1 %v1490_v60 }
 0x16b   :  { %689 = vmatmul.mubr.bf16.gmra.mrb[24].mxu1 %v1492_v61 }
 0x16c   :  { %696 = vmatprep.mubr.bf16.mxu1 %v1496_v62 }
 0x173   :  { %697 = vmatmul.mubr.bf16.gmra.mrb[28].mxu1 %v1498_v63 }
 0x174   :  { %704 = vmatprep.mubr.bf16.mxu1 %v1499_v0 }
 0x17b   :  { %705 = vmatmul.mubr.bf16.gmra.mrb[32].mxu1 %v1501_v1 }
 0x17c   :  { %712 = vmatprep.mubr.bf16.mxu1 %v1505_v2 }
 0x183   :  { %713 = vmatmul.mubr.bf16.gmra.mrb[36].mxu1 %v1507_v3 }
 0x184   :  { %720 = vmatprep.mubr.bf16.mxu1 %v1511_v4 }
 0x18b   :  { %721 = vmatmul.mubr.bf16.gmra.mrb[40].mxu1 %v1513_v5 }
 0x18c   :  { %728 = vmatprep.mubr.bf16.mxu1 %v1517_v6 }
 0x193   :  { %729 = vmatmul.mubr.bf16.gmra.mrb[44].mxu1 %v1519_v7 }
 0x20e   :  { %v1327_v9 = vpop.f32.mrb[0].mxu1  ;;  %v1303_v10 = vpop.f32.mrb[32].mxu0 }
 0x20f   :  { %v1328_v11 = vpop.f32.mrb[1].mxu1  ;;  %v1304_v12 = vpop.f32.mrb[33].mxu0 }
 0x210   :  { %v1330_v13 = vpop.f32.mrb[2].mxu1  ;;  %v1305_v14 = vadd.f32 %v1304_v12, %v1303_v10  ;;  %v1306_v15 = vpop.f32.mrb[34].mxu0 }
 0x211   :  { %v1331_v16 = vpop.f32.mrb[3].mxu1  ;;  %v1307_v18 = vpop.f32.mrb[35].mxu0 }
 0x212   :  { %v1308_v19 = vadd.f32 %v1307_v18, %v1306_v15  ;;  %v942_v20 = vadd.f32 %v1305_v14, %v1262_v17 }
 0x214   :  { %1070 = vst [vmem:[%s1892_s6] sm:$0xff] %v942_v20  ;;  %v1140_v22 = vmul.f32 %v942_v20, %v942_v20  ;;  %v943_v23 = vadd.f32 %v1308_v19, %v1262_v17 }
 0x216   :  { %v1333_v21 = vpop.f32.mrb[4].mxu1  ;;  %v1309_v24 = vpop.f32.mrb[36].mxu0  ;;  %1071 = vst [vmem:[%s1892_s6 + $0x8] sm:$0xff] %v943_v23  ;;  %v1102_v28 = vadd.f32 %v943_v23, %v942_v20  ;;  %v1141_v29 = vmul.f32 %v943_v23, %v943_v23 }
 0x217   :  { %v1334_v25 = vpop.f32.mrb[5].mxu1  ;;  %v1310_v26 = vpop.f32.mrb[37].mxu0 }
 0x218   :  { %v1336_v27 = vpop.f32.mrb[6].mxu1  ;;  %v1312_v30 = vpop.f32.mrb[38].mxu0  ;;  %v1133_v33 = vrot.slane %v1102_v28, 4  ;;  %v1172_v34 = vadd.f32 %v1141_v29, %v1140_v22 }
 0x219   :  { %v1337_v31 = vpop.f32.mrb[7].mxu1  ;;  %v1313_v32 = vpop.f32.mrb[39].mxu0 }
 0x21a   :  { %v1134_v35 = vadd.f32 %v1133_v33, %v1102_v28  ;;  %v1203_v36 = vrot.slane %v1172_v34, 4 }
 0x21c   :  { %v1135_v38 = vrot.slane %v1134_v35, 2  ;;  %v1204_v39 = vadd.f32 %v1203_v36, %v1172_v34 }
 0x21e   :  { %v1339_v37 = vpop.f32.mrb[8].mxu1  ;;  %v1315_v40 = vpop.f32.mrb[40].mxu0  ;;  %v1136_v44 = vadd.f32 %v1135_v38, %v1134_v35  ;;  %v1205_v45 = vrot.slane %v1204_v39, 2 }
 0x21f   :  { %v1340_v41 = vpop.f32.mrb[9].mxu1  ;;  %v1316_v42 = vpop.f32.mrb[41].mxu0 }
 0x220   :  { %v1342_v43 = vpop.f32.mrb[10].mxu1  ;;  %v1318_v46 = vpop.f32.mrb[42].mxu0  ;;  %v1137_v49 = vrot.slane %v1136_v44, 1  ;;  %v1206_v50 = vadd.f32 %v1205_v45, %v1204_v39 }
 0x221   :  { %v1343_v47 = vpop.f32.mrb[11].mxu1  ;;  %v1319_v48 = vpop.f32.mrb[43].mxu0 }
 0x222   :  { %v1138_v51 = vadd.f32 %v1137_v49, %v1136_v44  ;;  %v1207_v52 = vrot.slane %v1206_v50, 1 }
 0x224   :  { %1139 = vst [vmem:[%s1894_s7] sm:$0x1] %v1138_v51  ;;  %v1208_v54 = vadd.f32 %v1207_v52, %v1206_v50 }
 0x226   :  { %v1345_v53 = vpop.f32.mrb[12].mxu1  ;;  %v1321_v55 = vpop.f32.mrb[44].mxu0  ;;  %1209 = vst [vmem:[%s1895_s8] sm:$0x1] %v1208_v54 }
 0x227   :  { %v1346_v56 = vpop.f32.mrb[13].mxu1  ;;  %v1322_v57 = vpop.f32.mrb[45].mxu0 }
 0x228   :  { %v1348_v58 = vpop.f32.mrb[14].mxu1  ;;  %v1324_v59 = vpop.f32.mrb[46].mxu0 }
 0x229   :  { %v1349_v60 = vpop.f32.mrb[15].mxu1  ;;  %v1325_v61 = vpop.f32.mrb[47].mxu0 }
 0x22e   :  { %v1351_v62 = vpop.f32.mrb[16].mxu1 }
 0x22f   :  { %v1352_v63 = vpop.f32.mrb[17].mxu1 }
 0x230   :  { %v1354_v0 = vpop.f32.mrb[18].mxu1 }
 0x231   :  { %v1355_v1 = vpop.f32.mrb[19].mxu1 }
 0x236   :  { %v1357_v2 = vpop.f32.mrb[20].mxu1 }
 0x237   :  { %v1358_v3 = vpop.f32.mrb[21].mxu1 }
 0x238   :  { %v1360_v4 = vpop.f32.mrb[22].mxu1 }
 0x239   :  { %v1361_v5 = vpop.f32.mrb[23].mxu1 }
 0x23e   :  { %v1363_v6 = vpop.f32.mrb[24].mxu1 }
 0x23f   :  { %v1364_v7 = vpop.f32.mrb[25].mxu1 }
 0x240   :  { %v1366_v8 = vpop.f32.mrb[26].mxu1 }
 0x241   :  { %v1367_v9 = vpop.f32.mrb[27].mxu1 }
 0x246   :  { %v1369_v10 = vpop.f32.mrb[28].mxu1 }
 0x247   :  { %v1370_v11 = vpop.f32.mrb[29].mxu1 }
 0x248   :  { %v1372_v12 = vpop.f32.mrb[30].mxu1 }
 0x249   :  { %v1373_v13 = vpop.f32.mrb[31].mxu1 }
 0x24e   :  { %v1375_v14 = vpop.f32.mrb[32].mxu1 }
 0x24f   :  { %v1376_v15 = vpop.f32.mrb[33].mxu1 }
 0x250   :  { %v1378_v16 = vpop.f32.mrb[34].mxu1 }
 0x251   :  { %v1379_v17 = vpop.f32.mrb[35].mxu1 }
 0x256   :  { %v1381_v18 = vpop.f32.mrb[36].mxu1 }
 0x257   :  { %v1382_v19 = vpop.f32.mrb[37].mxu1 }
 0x258   :  { %v1384_v20 = vpop.f32.mrb[38].mxu1 }
 0x259   :  { %v1385_v21 = vpop.f32.mrb[39].mxu1 }
 0x25e   :  { %v1387_v22 = vpop.f32.mrb[40].mxu1 }
 0x25f   :  { %v1388_v23 = vpop.f32.mrb[41].mxu1 }
 0x260   :  { %v1390_v24 = vpop.f32.mrb[42].mxu1 }
 0x261   :  { %v1391_v25 = vpop.f32.mrb[43].mxu1 }
 0x266   :  { %v1393_v26 = vpop.f32.mrb[44].mxu1 }
 0x267   :  { %v1394_v27 = vpop.f32.mrb[45].mxu1 }
 0x268   :  { %v1396_v28 = vpop.f32.mrb[46].mxu1 }
 0x269   :  { %v1397_v29 = vpop.f32.mrb[47].mxu1 }

</bundles_post_ra>
